<compile_context>
chip_gen: v7x
topology: tpu7x:2x2x1
jax: 0.10.0
libtpu: 0.0.40
codegen_flags: <defaults>
</compile_context>

<pallas_src>
import functools

import jax
import jax.numpy as jnp
from jax.experimental import pallas as pl
from jax.experimental.pallas import tpu as pltpu


def _round_up(x, m):
    return ((x + m - 1) // m) * m


# ----------------------------------------------------------------------------
# Pallas kernel: 1x1 conv (matmul) + sigmoid + YOLO box decode for one row tile.
# ----------------------------------------------------------------------------
def _detect_layer_kernel(x_ref, w_ref, c_ref, raw_ref, dec_ref, *,
                         stride, nx, hw, tm):
    # 1x1 conv == matmul over channels (MXU).
    acc = jnp.dot(x_ref[...], w_ref[...], preferred_element_type=jnp.float32)

    # Packed per-channel constants (single (8, Cpad) block).
    bias = c_ref[0:1, :]
    amul = c_ref[1:2, :]   # anchor_w on k==2, anchor_h on k==3, else 0
    mx0  = c_ref[2:3, :]   # 1.0 on channel k==0 (x)
    my1  = c_ref[3:4, :]   # 1.0 on channel k==1 (y)
    mxy  = c_ref[4:5, :]   # 1.0 on k in {0,1}
    mwh  = c_ref[5:6, :]   # 1.0 on k in {2,3}
    mres = c_ref[6:7, :]   # 1.0 on remaining (obj/class) channels, 0 on padding

    raw = acc + bias
    raw_ref[...] = raw                         # pre-sigmoid output (== x[i] in torch)

    # sigmoid (EUP exp + divide)
    s = 1.0 / (1.0 + jnp.exp(-raw))
    t = s * 2.0

    # In-kernel grid offsets: row -> (gy, gx) of the feature map.
    # Rows are flattened as b*(ny*nx) + y*nx + x.  Float math is exact here
    # (indices << 2^24).
    row = pl.program_id(0) * tm + jax.lax.broadcasted_iota(jnp.int32, (tm, 1), 0)
    row_f = row.astype(jnp.float32)
    sp = row_f - jnp.floor(row_f / float(hw)) * float(hw)   # y*nx + x
    gy = jnp.floor(sp / float(nx))
    gx = sp - gy * float(nx)
    grid_add = gx * mx0 + gy * my1                          # (tm, Cpad)

    # xy decode: (2*sig - 0.5 + grid) * stride ; wh decode: (2*sig)^2 * anchor
    xy = (t - 0.5 + grid_add) * stride
    wh = (t * t) * amul
    dec_ref[...] = mxy * xy + mwh * wh + mres * s


def detect_layer_pallas(x_nchw, w, b, anchors_i, stride_i, nc, tm_max=256):
    """One detection layer.

    x_nchw:    (bs, cin, ny, nx) float32
    w:         (na*no, cin) conv weight (1x1 kernel squeezed)
    b:         (na*no,) conv bias
    anchors_i: (na, 2) anchors for this layer
    stride_i:  python float, stride for this layer
    Returns (x_out, z_out):
        x_out: (bs, na, ny, nx, no)  pre-sigmoid, as in training output
        z_out: (bs, na*ny*nx, no)    decoded boxes
    """
    bs, cin, ny, nx = x_nchw.shape
    na = anchors_i.shape[0]
    no = nc + 5
    C = na * no
    Cp = _round_up(C, 128)       # lane-dense output width
    M = bs * ny * nx

    # layout: NCHW -> NHWC -> (M, Cin)   (layout plumbing done in XLA)
    x_flat = jnp.transpose(x_nchw, (0, 2, 3, 1)).reshape(M, cin)
    w2 = jnp.transpose(w, (1, 0))                         # (cin, C)
    w2 = jnp.pad(w2, ((0, 0), (0, Cp - C)))               # zero-pad channels

    # Packed per-channel constants (8, Cp): bias / anchor-mul / masks.
    k = jnp.arange(C) % no                                # channel id within anchor
    a_idx = jnp.arange(C) // no                           # anchor id
    amul = jnp.where(k == 2, anchors_i[a_idx, 0], 0.0)
    amul = jnp.where(k == 3, anchors_i[a_idx, 1], amul).astype(jnp.float32)
    mx0 = (k == 0).astype(jnp.float32)
    my1 = (k == 1).astype(jnp.float32)
    mxy = (k < 2).astype(jnp.float32)
    mwh = ((k == 2) | (k == 3)).astype(jnp.float32)
    mres = 1.0 - mxy - mwh

    def padc(v):
        return jnp.pad(v.astype(jnp.float32), (0, Cp - C))

    consts = jnp.stack([padc(b), padc(amul), padc(mx0), padc(my1),
                        padc(mxy), padc(mwh), padc(mres),
                        jnp.zeros((Cp,), jnp.float32)], axis=0)   # (8, Cp)

    # Row tiling: multiple of 8 (sublane), sized for VMEM; full M if small.
    tm = M if M <= tm_max else tm_max
    grid_m = pl.cdiv(M, tm)

    kernel = functools.partial(_detect_layer_kernel, stride=float(stride_i),
                               nx=nx, hw=ny * nx, tm=tm)

    raw_p, dec_p = pl.pallas_call(
        kernel,
        out_shape=(jax.ShapeDtypeStruct((M, Cp), jnp.float32),
                   jax.ShapeDtypeStruct((M, Cp), jnp.float32)),
        grid=(grid_m,),
        in_specs=[
            pl.BlockSpec((tm, cin), lambda i: (i, 0)),    # activations (tiled)
            pl.BlockSpec((cin, Cp), lambda i: (0, 0)),    # weights (resident)
            pl.BlockSpec((8, Cp), lambda i: (0, 0)),      # packed constants
        ],
        out_specs=(pl.BlockSpec((tm, Cp), lambda i: (i, 0)),
                   pl.BlockSpec((tm, Cp), lambda i: (i, 0))),
        compiler_params=pltpu.CompilerParams(
            dimension_semantics=("parallel",)),
    )(x_flat, w2, consts)

    # Strip channel padding and restore torch axis convention (bs, na, ny, nx, no).
    raw = raw_p[:, :C]
    dec = dec_p[:, :C]
    raw5 = raw.reshape(bs, ny, nx, na, no).transpose(0, 3, 1, 2, 4)
    dec5 = dec.reshape(bs, ny, nx, na, no).transpose(0, 3, 1, 2, 4)
    z = dec5.reshape(bs, na * ny * nx, no)
    return raw5, z


def detect_forward_pallas(x_list, weights, biases, anchors, strides, nc):
    """Full Detect.forward (eval mode): returns (cat(z,1), [x_i permuted])."""
    outs, zs = [], []
    for i, x in enumerate(x_list):
        raw5, z = detect_layer_pallas(x, weights[i], biases[i], anchors[i],
                                      strides[i], nc)
        outs.append(raw5)
        zs.append(z)
    return jnp.concatenate(zs, axis=1), outs


# ----------------------------------------------------------------------------
# Pure-JAX reference (mirrors the PyTorch code) for a correctness check.
# ----------------------------------------------------------------------------
def detect_forward_ref(x_list, weights, biases, anchors, strides, nc):
    na = anchors.shape[1]
    no = nc + 5
    outs, zs = [], []
    for i, x in enumerate(x_list):
        bs, cin, ny, nx = x.shape
        conv = jnp.einsum("bchw,oc->bohw", x, weights[i],
                          precision=jax.lax.Precision.HIGHEST)
        conv = conv + biases[i][None, :, None, None]
        xi = conv.reshape(bs, na, no, ny, nx).transpose(0, 1, 3, 4, 2)
        outs.append(xi)
        y = jax.nn.sigmoid(xi)
        gy, gx = jnp.meshgrid(jnp.arange(ny, dtype=jnp.float32),
                              jnp.arange(nx, dtype=jnp.float32), indexing="ij")
        grid = jnp.stack([gx, gy], axis=-1)[None, None]            # (1,1,ny,nx,2)
        xy = (y[..., 0:2] * 2.0 - 0.5 + grid) * strides[i]
        wh = (y[..., 2:4] * 2.0) ** 2 * anchors[i].reshape(1, na, 1, 1, 2)
        y = jnp.concatenate([xy, wh, y[..., 4:]], axis=-1)
        zs.append(y.reshape(bs, -1, no))
    return jnp.concatenate(zs, axis=1), outs


if __name__ == "__main__":
    # Small, deterministic configuration consistent with the module.
    nc = 3                                   # num classes -> no = 8
    anchor_list = [[10, 13, 16, 30, 33, 23],
                   [30, 61, 62, 45, 59, 119],
                   [116, 90, 156, 198, 373, 326]]
    nl = len(anchor_list)
    na = len(anchor_list[0]) // 2
    no = nc + 5
    ch = (4, 8, 16)
    strides = [8.0, 16.0, 32.0]              # Detect.stride is set externally in YOLOv5
    bs = 2
    spatial = [(16, 16), (8, 8), (4, 4)]

    anchors = jnp.asarray(anchor_list, dtype=jnp.float32).reshape(nl, na, 2)

    key = jax.random.PRNGKey(0)
    weights, biases, x_list = [], [], []
    for i in range(nl):
        key, kw, kb, kx = jax.random.split(key, 4)
        weights.append(0.1 * jax.random.normal(kw, (na * no, ch[i]), jnp.float32))
        biases.append(0.1 * jax.random.normal(kb, (na * no,), jnp.float32))
        ny, nx = spatial[i]
        x_list.append(jax.random.normal(kx, (bs, ch[i], ny, nx), jnp.float32))

    z_pallas, x_pallas = detect_forward_pallas(x_list, weights, biases,
                                               anchors, strides, nc)
    jax.block_until_ready(z_pallas)
    for xo in x_pallas:
        jax.block_until_ready(xo)

    # Cross-check against a plain-JAX reference of the same math.
    z_ref, x_ref = detect_forward_ref(x_list, weights, biases, anchors, strides, nc)
    assert z_pallas.shape == (bs, na * sum(h * w for h, w in spatial), no)
    assert jnp.allclose(z_pallas, z_ref, rtol=1e-3, atol=1e-2)
    for a, b in zip(x_pallas, x_ref):
        assert a.shape == b.shape
        assert jnp.allclose(a, b, rtol=1e-3, atol=1e-3)

    print("KERNEL_OK")
</pallas_src>

<mosaic_0001>
module attributes {stable_mosaic.version = 11 : i64} {
  func.func @_detect_layer_kernel(%arg0: i32, %arg1: memref<256x4xf32, #tpu.memory_space<vmem>>, %arg2: memref<4x128xf32, #tpu.memory_space<vmem>>, %arg3: memref<8x128xf32, #tpu.memory_space<vmem>>, %arg4: memref<256x128xf32, #tpu.memory_space<vmem>>, %arg5: memref<256x128xf32, #tpu.memory_space<vmem>>) attributes {dimension_semantics = [#tpu.dimension_semantics<parallel>], iteration_bounds = array<i64: 2>, scalar_prefetch = 0 : i64, scratch_operands = 0 : i64, tpu.core_type = #tpu.core_type<tc>, window_params = [{transform_indices = @transform_0, window_bounds = array<i64: 256, 4>}, {pipeline_mode = #tpu.pipeline_mode<synchronous>, transform_indices = @transform_1, window_bounds = array<i64: 4, 128>}, {pipeline_mode = #tpu.pipeline_mode<synchronous>, transform_indices = @transform_2, window_bounds = array<i64: 8, 128>}, {transform_indices = @transform_3, window_bounds = array<i64: 256, 128>}, {transform_indices = @transform_4, window_bounds = array<i64: 256, 128>}]} {
    %c0 = arith.constant 0 : index
    %c0_0 = arith.constant 0 : index
    %0 = vector.load %arg1[%c0, %c0_0] : memref<256x4xf32, #tpu.memory_space<vmem>>, vector<256x4xf32>
    %c0_1 = arith.constant 0 : index
    %c0_2 = arith.constant 0 : index
    %1 = vector.load %arg2[%c0_1, %c0_2] : memref<4x128xf32, #tpu.memory_space<vmem>>, vector<4x128xf32>
    %cst = arith.constant dense<0.000000e+00> : vector<256x128xf32>
    %2 = tpu.matmul %0, %1, %cst {dimension_numbers = #tpu.dot_dimension_numbers<[1], [0], [0], [1], [0, 0, 1, 1], [], []>} : vector<256x4xf32>, vector<4x128xf32>, vector<256x128xf32> -> vector<256x128xf32>
    %c0_3 = arith.constant 0 : index
    %c0_4 = arith.constant 0 : index
    %3 = vector.load %arg3[%c0_3, %c0_4] : memref<8x128xf32, #tpu.memory_space<vmem>>, vector<1x128xf32>
    %c1 = arith.constant 1 : index
    %c0_5 = arith.constant 0 : index
    %4 = vector.load %arg3[%c1, %c0_5] : memref<8x128xf32, #tpu.memory_space<vmem>>, vector<1x128xf32>
    %c2 = arith.constant 2 : index
    %c0_6 = arith.constant 0 : index
    %5 = vector.load %arg3[%c2, %c0_6] : memref<8x128xf32, #tpu.memory_space<vmem>>, vector<1x128xf32>
    %c3 = arith.constant 3 : index
    %c0_7 = arith.constant 0 : index
    %6 = vector.load %arg3[%c3, %c0_7] : memref<8x128xf32, #tpu.memory_space<vmem>>, vector<1x128xf32>
    %c4 = arith.constant 4 : index
    %c0_8 = arith.constant 0 : index
    %7 = vector.load %arg3[%c4, %c0_8] : memref<8x128xf32, #tpu.memory_space<vmem>>, vector<1x128xf32>
    %c5 = arith.constant 5 : index
    %c0_9 = arith.constant 0 : index
    %8 = vector.load %arg3[%c5, %c0_9] : memref<8x128xf32, #tpu.memory_space<vmem>>, vector<1x128xf32>
    %c6 = arith.constant 6 : index
    %c0_10 = arith.constant 0 : index
    %9 = vector.load %arg3[%c6, %c0_10] : memref<8x128xf32, #tpu.memory_space<vmem>>, vector<1x128xf32>
    %10 = vector.broadcast %3 : vector<1x128xf32> to vector<256x128xf32>
    %11 = arith.addf %2, %10 : vector<256x128xf32>
    %c0_11 = arith.constant 0 : index
    %c0_12 = arith.constant 0 : index
    %12 = vector.load %arg4[%c0_11, %c0_12] : memref<256x128xf32, #tpu.memory_space<vmem>>, vector<256x128xf32>
    tpu.vector_store %arg4[%c0_11, %c0_12], %11 {strides = array<i32>} : memref<256x128xf32, #tpu.memory_space<vmem>>, vector<256x128xf32>,
    %cst_13 = arith.constant 0.000000e+00 : f32
    %13 = vector.broadcast %cst_13 : f32 to vector<256x128xf32>
    %14 = arith.subf %13, %11 : vector<256x128xf32>
    %15 = math.exp %14 : vector<256x128xf32>
    %cst_14 = arith.constant 1.000000e+00 : f32
    %16 = vector.broadcast %cst_14 : f32 to vector<256x128xf32>
    %17 = arith.addf %16, %15 : vector<256x128xf32>
    %cst_15 = arith.constant 1.000000e+00 : f32
    %18 = vector.broadcast %cst_15 : f32 to vector<256x128xf32>
    %19 = arith.divf %18, %17 : vector<256x128xf32>
    %cst_16 = arith.constant 2.000000e+00 : f32
    %20 = vector.broadcast %cst_16 : f32 to vector<256x128xf32>
    %21 = arith.mulf %19, %20 : vector<256x128xf32>
    %c256_i32 = arith.constant 256 : i32
    %22 = arith.muli %arg0, %c256_i32 : i32
    %23 = tpu.iota {dimensions = array<i32: 0>} : vector<256x1xi32>
    %24 = vector.broadcast %22 : i32 to vector<256x1xi32>
    %25 = arith.addi %24, %23 : vector<256x1xi32>
    %26 = arith.sitofp %25 : vector<256x1xi32> to vector<256x1xf32>
    %cst_17 = arith.constant 2.560000e+02 : f32
    %27 = vector.broadcast %cst_17 : f32 to vector<256x1xf32>
    %28 = arith.divf %26, %27 : vector<256x1xf32>
    %29 = math.floor %28 : vector<256x1xf32>
    %cst_18 = arith.constant 2.560000e+02 : f32
    %30 = vector.broadcast %cst_18 : f32 to vector<256x1xf32>
    %31 = arith.mulf %29, %30 : vector<256x1xf32>
    %32 = arith.subf %26, %31 : vector<256x1xf32>
    %cst_19 = arith.constant 1.600000e+01 : f32
    %33 = vector.broadcast %cst_19 : f32 to vector<256x1xf32>
    %34 = arith.divf %32, %33 : vector<256x1xf32>
    %35 = math.floor %34 : vector<256x1xf32>
    %cst_20 = arith.constant 1.600000e+01 : f32
    %36 = vector.broadcast %cst_20 : f32 to vector<256x1xf32>
    %37 = arith.mulf %35, %36 : vector<256x1xf32>
    %38 = arith.subf %32, %37 : vector<256x1xf32>
    %39 = vector.broadcast %38 : vector<256x1xf32> to vector<256x128xf32>
    %40 = vector.broadcast %5 : vector<1x128xf32> to vector<256x128xf32>
    %41 = arith.mulf %39, %40 : vector<256x128xf32>
    %42 = vector.broadcast %35 : vector<256x1xf32> to vector<256x128xf32>
    %43 = vector.broadcast %6 : vector<1x128xf32> to vector<256x128xf32>
    %44 = arith.mulf %42, %43 : vector<256x128xf32>
    %45 = arith.addf %41, %44 : vector<256x128xf32>
    %cst_21 = arith.constant 5.000000e-01 : f32
    %46 = vector.broadcast %cst_21 : f32 to vector<256x128xf32>
    %47 = arith.subf %21, %46 : vector<256x128xf32>
    %48 = arith.addf %47, %45 : vector<256x128xf32>
    %cst_22 = arith.constant 8.000000e+00 : f32
    %49 = vector.broadcast %cst_22 : f32 to vector<256x128xf32>
    %50 = arith.mulf %48, %49 : vector<256x128xf32>
    %51 = arith.mulf %21, %21 : vector<256x128xf32>
    %52 = vector.broadcast %4 : vector<1x128xf32> to vector<256x128xf32>
    %53 = arith.mulf %51, %52 : vector<256x128xf32>
    %54 = vector.broadcast %7 : vector<1x128xf32> to vector<256x128xf32>
    %55 = arith.mulf %54, %50 : vector<256x128xf32>
    %56 = vector.broadcast %8 : vector<1x128xf32> to vector<256x128xf32>
    %57 = arith.mulf %56, %53 : vector<256x128xf32>
    %58 = arith.addf %55, %57 : vector<256x128xf32>
    %59 = vector.broadcast %9 : vector<1x128xf32> to vector<256x128xf32>
    %60 = arith.mulf %59, %19 : vector<256x128xf32>
    %61 = arith.addf %58, %60 : vector<256x128xf32>
    %c0_23 = arith.constant 0 : index
    %c0_24 = arith.constant 0 : index
    %62 = vector.load %arg5[%c0_23, %c0_24] : memref<256x128xf32, #tpu.memory_space<vmem>>, vector<256x128xf32>
    tpu.vector_store %arg5[%c0_23, %c0_24], %61 {strides = array<i32>} : memref<256x128xf32, #tpu.memory_space<vmem>>, vector<256x128xf32>,
    return
  }
  func.func @transform_0(%arg0: i32) -> (i32, i32) {
    %c0_i32 = arith.constant 0 : i32
    %c0_i32_0 = arith.constant 0 : i32
    return %arg0, %c0_i32 : i32, i32
  }
  func.func @transform_1(%arg0: i32) -> (i32, i32) {
    %c0_i32 = arith.constant 0 : i32
    %c0_i32_0 = arith.constant 0 : i32
    %c0_i32_1 = arith.constant 0 : i32
    return %c0_i32, %c0_i32_0 : i32, i32
  }
  func.func @transform_2(%arg0: i32) -> (i32, i32) {
    %c0_i32 = arith.constant 0 : i32
    %c0_i32_0 = arith.constant 0 : i32
    %c0_i32_1 = arith.constant 0 : i32
    return %c0_i32, %c0_i32_0 : i32, i32
  }
  func.func @transform_3(%arg0: i32) -> (i32, i32) {
    %c0_i32 = arith.constant 0 : i32
    %c0_i32_0 = arith.constant 0 : i32
    return %arg0, %c0_i32 : i32, i32
  }
  func.func @transform_4(%arg0: i32) -> (i32, i32) {
    %c0_i32 = arith.constant 0 : i32
    %c0_i32_0 = arith.constant 0 : i32
    return %arg0, %c0_i32 : i32, i32
  }
}

</mosaic_0001>

<bundles_post_ra>
// kernel: tpu_custom_call.1
= control target key start
LH: loop header
LB: loop body
LE: loop exit
PB: predicated region body
PF: predicated region fallthrough
CT: control target
= control target key end

     0   :  { %10 = vsyncpa [#allocation3], 0  ;;  %s3468_s0 = inlined_call_operand.vmem [shape: f32[512,4], index: 0, kind: input, shape index: {}]   ;;  %s3469_s1 = inlined_call_operand.vmem [shape: f32[4,128], index: 1, kind: input, shape index: {}]   ;;  %s3470_s2 = inlined_call_operand.vmem [shape: f32[8,128], index: 2, kind: input, shape index: {}]   ;;  %s3471_s3 = inlined_call_operand.hbm [shape: f32[512,128], index: 3, kind: output, shape index: {0}]   ;;  %s3472_s4 = inlined_call_operand.hbm [shape: f32[512,128], index: 4, kind: output, shape index: {1}]  }
   0x1   :  { %12 = vsyncpa [#allocation3 + $0x1], 0 }
   0x2   :  { %13 = vsyncpa [#allocation5], 0 }
   0x3   :  { %15 = vsyncpa [#allocation5 + $0x1], 0  ;;  %s2277_s15 = smov 0   ;;  %s2279_s16 = smov 0  }
   0x4   :  { %s2281_s17 = smov 0   ;;  %s2283_s18 = smov 0  }
   0x5 LB: > { %s2298_s19 = sadd.s32 4294967295, %s2246_s18   ;;  %s1795_s20 = sadd.s32 4294967294, %s2246_s18   ;;  %s2246_s18 = sphi %s2283_s18, %s3551_s18   ;;  %s2242_s17 = sphi %s2281_s17, %s3550_s17   ;;  %s2238_s16 = sphi %s2279_s16, %s3549_s16   ;;  %s2234_s15 = sphi %s2277_s15, %s3548_s15  }
   0x6   : > { %s2302_s21 = sadd.s32 1, %s2246_s18   ;;  %s96_s22 = sadd.s32 1, %s2242_s17 }
   0x7   : > { %s93_s23 = ssub.s32 %s2246_s18, %s2302_s21  ;;  %p106_p0 = scmp.ne.s32.totalorder %s2242_s17, %s2238_s16 }
   0x8   : > { %p94_p1 = scmp.eq.s32.totalorder %s93_s23, 0  ;;  %p107_p2 = scmp.eq.s32.totalorder %s2298_s19, 1 }
   0x9   : > { %p112_p3 = scmp.ne.s32.totalorder %s2238_s16, %s2234_s15  ;;  %p113_p4 = scmp.eq.s32.totalorder %s1795_s20, 1 }
   0xa   : > { %s2313_s24 = scalar_select %p94_p1, %s2242_s17, %s96_s22  }
   0xb   : > { %p2315_p5 = por %p107_p2, %p106_p0  ;;  %p2319_p6 = por %p113_p4, %p112_p3 }
   0xc   : > { %p1798_p7 = scmp.ge.s32.totalorder %s2246_s18, 1  ;;  %p172_p8 = scmp.lt.s32.totalorder %s2246_s18, 3 }
   0xe   : > { %p173_p9 = pnand %p1798_p7, %p172_p8 }
  0x10   : > { %176 = sbr.rel (%p173_p9) target bundleno = 437 (0x1b5), region = 32 }
  0x17   : > { %v243_v0 = vld [vmem:[%s3469_s1] sm:$0xf]  ;;  %vm352_vm0 = vcmask 1043456   ;;  %s1801_s29 = sshll.u32 %s2298_s19, 5  ;;  %vm255_vm1 = vcmask 31744   ;;  %v838_v33 = vlaneseq  ;;  %s1837_s8 = sshll.u32 %s2298_s19, 8 }
  0x18   : > { %1919 = vmatprep.subr.msk.mxu0 %vm352_vm0, %v243_v0  ;;  %1969 = vmatprep.subr.msk.mxu1 %vm352_vm0, %v243_v0  ;;  %p204_p10 = scmp.lt.s32.totalorder %s1801_s29, 63  ;;  %v2402_v36 = vstv %s1837_s8  ;;  %s2764_s13 = sand.u32 1, %s2238_s16  }
  0x19   : > { %1920 = vmatpush3.msk.msra.mxu0 %vm352_vm0, %v243_v0  ;;  %1970 = vmatpush3.msk.msra.mxu1 %vm352_vm0, %v243_v0  ;;  %v2398_v34 = vshrl.u32 %v838_v33, 7  ;;  %3488 = vst [vmem:[#allocation9_spill] sm:$0xff] %v2402_v36  ;;  %s1799_s14 = sshll.u32 %s2764_s13, 8  ;;  %s1884_s12 = sshll.u32 %s2298_s19, 12 }
  0x1a   : > { %s3553_s29 = smov (!%p204_p10, %s1801_s29), 63  ;;  %s2825_s23 = scalar_lea.vmem [#allocation2], %s1799_s14 }
  0x1b   : > { %s1802_s30 = sshll.u32 %s3553_s29, 3  ;;  %3487 = vst [vmem:[#allocation8_spill] sm:$0xff] %v2398_v34  ;;  %v840_v35 = vadd.s32 8, %v2398_v34  ;;  %v856_v37 = vadd.s32 136, %v2398_v34  ;;  %v855_v40 = vadd.s32 128, %v2398_v34  ;;  %v872_v42 = vadd.s32 %v2402_v36, %v2398_v34  ;;  %s3017_s9 = scalar_lea.vmem [#allocation4], %s1799_s14 }
  0x1c   : > { %s2332_s7 = scalar_lea.vmem %s3468_s0, %s1802_s30  ;;  %v842_v43 = vadd.s32 24, %v2398_v34  ;;  %v858_v50 = vadd.s32 152, %v2398_v34  ;;  %v841_v57 = vadd.s32 16, %v2398_v34  ;;  %v857_v58 = vadd.s32 144, %v2398_v34  ;;  %s1685_s14 = sshll.u32 %s2825_s23, 4  ;;  %s3291_s14 = int_to_ptr.vmem [resolvable:$true] %s1685_s14 }
  0x1d   : > { %v211_v1 = vld [vmem:[%s2332_s7] sm:$0xff]  ;;  %v212_v3 = vld [vmem:[%s2332_s7 + $0x8] sm:$0xff]  ;;  %v213_v5 = vld [vmem:[%s2332_s7 + $0x10] sm:$0xff]  ;;  %v873_v38 = vadd.s32 %v2402_v36, %v840_v35  ;;  %v889_v39 = vadd.s32 %v2402_v36, %v856_v37  ;;  %v888_v45 = vadd.s32 %v2402_v36, %v855_v40  ;;  %v904_v47 = vcvt.s32.f32 %v872_v42  ;;  %s3289_s27 = scalar_lea.hbm %s3471_s3, %s1884_s12  ;;  %s2152_s6 = scalar_lea.vmem %s3291_s14, 4096 }
  0x1e   : > { %v227_v2 = vld [vmem:[%s2332_s7 + $0x80] sm:$0xff]  ;;  %1921 = vmatprep.mubr.msk.f32.mxu0 %vm255_vm1, %v211_v1  ;;  %v228_v4 = vld [vmem:[%s2332_s7 + $0x88] sm:$0xff]  ;;  %v229_v6 = vld [vmem:[%s2332_s7 + $0x90] sm:$0xff]  ;;  %v875_v48 = vadd.s32 %v2402_v36, %v842_v43  ;;  %v891_v56 = vadd.s32 %v2402_v36, %v858_v50  ;;  %v874_v1 = vadd.s32 %v2402_v36, %v841_v57  ;;  %p2153_p11 = scmp.ne.s32.totalorder %s3291_s14, %s2152_s6 }
  0x1f   : > { %1945 = vmatprep.mubr.msk.f32.mxu1 %vm255_vm1, %v227_v2  ;;  %1922 = vmatmul.mubr.msk.f32.vlgmr.msra.gmra.mrb[0].mxu0 %vm255_vm1, %v212_v3  ;;  %v214_v7 = vld [vmem:[%s2332_s7 + $0x18] sm:$0xff]  ;;  %v215_v9 = vld [vmem:[%s2332_s7 + $0x20] sm:$0xff]  ;;  %v216_v11 = vld [vmem:[%s2332_s7 + $0x28] sm:$0xff]  ;;  %v905_v41 = vcvt.s32.f32 %v873_v38  ;;  %v921_v44 = vcvt.s32.f32 %v889_v39  ;;  %v920_v51 = vcvt.s32.f32 %v888_v45  ;;  %v937_v53 = vmul.f32 0.00390625, %v904_v47 }
  0x20   : > { %1946 = vmatmul.mubr.msk.f32.vlgmr.msra.gmra.mrb[0].mxu1 %vm255_vm1, %v228_v4  ;;  %1924 = vmatprep.mubr.msk.f32.mxu0 %vm255_vm1, %v213_v5  ;;  %v230_v8 = vld [vmem:[%s2332_s7 + $0x98] sm:$0xff]  ;;  %v231_v10 = vld [vmem:[%s2332_s7 + $0xa0] sm:$0xff]  ;;  %v232_v12 = vld [vmem:[%s2332_s7 + $0xa8] sm:$0xff]  ;;  %v907_v54 = vcvt.s32.f32 %v875_v48  ;;  %v923_v0 = vcvt.s32.f32 %v891_v56  ;;  %v890_v2 = vadd.s32 %v2402_v36, %v857_v58  ;;  %v844_v5 = vadd.s32 40, %v2398_v34  ;;  %p2154_p12 = pnand %p2153_p11, %p2315_p5 }
  0x21   : > { %1948 = vmatprep.mubr.msk.f32.mxu1 %vm255_vm1, %v229_v6  ;;  %v217_v13 = vld [vmem:[%s2332_s7 + $0x30] sm:$0xff]  ;;  %v218_v15 = vld [vmem:[%s2332_s7 + $0x38] sm:$0xff]  ;;  %v219_v17 = vld [vmem:[%s2332_s7 + $0x40] sm:$0xff]  ;;  %v938_v46 = vmul.f32 0.00390625, %v905_v41  ;;  %v954_v49 = vmul.f32 0.00390625, %v921_v44  ;;  %v953_v59 = vmul.f32 0.00390625, %v920_v51  ;;  %v969_v61 = vfloor.f32 %v937_v53 }
  0x22   : > { %v233_v14 = vld [vmem:[%s2332_s7 + $0xb0] sm:$0xff]  ;;  %v234_v16 = vld [vmem:[%s2332_s7 + $0xb8] sm:$0xff]  ;;  %v235_v18 = vld [vmem:[%s2332_s7 + $0xc0] sm:$0xff]  ;;  %v940_v62 = vmul.f32 0.00390625, %v907_v54  ;;  %p2155_p13 = pneg %p2154_p12 }
  0x23   : > { %1925 = vmatmul.mubr.msk.f32.gmra.mrb[2].mxu0 %vm255_vm1, %v214_v7  ;;  %v220_v19 = vld [vmem:[%s2332_s7 + $0x48] sm:$0xff]  ;;  %v221_v21 = vld [vmem:[%s2332_s7 + $0x50] sm:$0xff]  ;;  %v222_v23 = vld [vmem:[%s2332_s7 + $0x58] sm:$0xff]  ;;  %v970_v52 = vfloor.f32 %v938_v46  ;;  %v986_v55 = vfloor.f32 %v954_v49  ;;  %v985_v3 = vfloor.f32 %v953_v59  ;;  %v1001_v6 = vmul.f32 256.0, %v969_v61 }
  0x24   : > { %1949 = vmatmul.mubr.msk.f32.gmra.mrb[2].mxu1 %vm255_vm1, %v230_v8  ;;  %1927 = vmatprep.mubr.msk.f32.mxu0 %vm255_vm1, %v215_v9  ;;  %v236_v20 = vld [vmem:[%s2332_s7 + $0xc8] sm:$0xff]  ;;  %v237_v22 = vld [vmem:[%s2332_s7 + $0xd0] sm:$0xff]  ;;  %v238_v24 = vld [vmem:[%s2332_s7 + $0xd8] sm:$0xff]  ;;  %v972_v7 = vfloor.f32 %v940_v62  ;;  %v956_v9 = vmul.f32 0.00390625, %v923_v0 }
  0x25   : > { %1951 = vmatprep.mubr.msk.f32.mxu1 %vm255_vm1, %v231_v10  ;;  %v223_v25 = vld [vmem:[%s2332_s7 + $0x60] sm:$0xff]  ;;  %v224_v27 = vld [vmem:[%s2332_s7 + $0x68] sm:$0xff]  ;;  %v225_v29 = vld [vmem:[%s2332_s7 + $0x70] sm:$0xff]  ;;  %v1002_v60 = vmul.f32 256.0, %v970_v52  ;;  %v1018_v63 = vmul.f32 256.0, %v986_v55  ;;  %v906_v10 = vcvt.s32.f32 %v874_v1  ;;  %v846_v52 = vadd.s32 56, %v2398_v34 }
  0x26   : > { %v239_v26 = vld [vmem:[%s2332_s7 + $0xe0] sm:$0xff]  ;;  %v240_v28 = vld [vmem:[%s2332_s7 + $0xe8] sm:$0xff]  ;;  %v241_v30 = vld [vmem:[%s2332_s7 + $0xf0] sm:$0xff] }
  0x27   : > { %1928 = vmatmul.mubr.msk.f32.gmra.mrb[4].mxu0 %vm255_vm1, %v216_v11  ;;  %v226_v31 = vld [vmem:[%s2332_s7 + $0x78] sm:$0xff]  ;;  %v2419_v4 = vsub.f32 %v905_v41, %v1002_v60  ;;  %v2422_v8 = vsub.f32 %v921_v44, %v1018_v63  ;;  %v922_v11 = vcvt.s32.f32 %v890_v2  ;;  %v2464_v56 = vld [vmem:[%s3470_s2 + $0x2] ss:$0 sm:$0xff]  ;;  %v2469_v60 = vld [vmem:[%s3470_s2 + $0x3] ss:$0 sm:$0xff] }
  0x28   : > { %1952 = vmatmul.mubr.msk.f32.gmra.mrb[4].mxu1 %vm255_vm1, %v232_v12  ;;  %1930 = vmatprep.mubr.msk.f32.mxu0 %vm255_vm1, %v217_v13  ;;  %v242_v32 = vld [vmem:[%s2332_s7 + $0xf8] sm:$0xff]  ;;  %v1017_v12 = vmul.f32 256.0, %v985_v3  ;;  %v860_v13 = vadd.s32 168, %v2398_v34  ;;  %v2480_v3 = vadd.s32 %v2402_v36, %v846_v52  ;;  %s2248_s7 = smov [#allocation2]  }
  0x29   : > { %1954 = vmatprep.mubr.msk.f32.mxu1 %vm255_vm1, %v233_v14  ;;  %v1067_v14 = vmul.f32 0.0625, %v2419_v4  ;;  %s2156_s8 = sshll.u32 %s2248_s7, 4  ;;  %s2157_s8 = int_to_ptr.vmem [resolvable:$false] %s2156_s8 }
  0x2a   : > { %s2158_s10 = scalar_lea.vmem %s2157_s8, 8192  ;;  %p2159_p0 = scmp.lt.s32.totalorder %s3291_s14, %s2157_s8 }
  0x2b   : > { %1931 = vmatmul.mubr.msk.f32.gmra.mrb[6].mxu0 %vm255_vm1, %v218_v15  ;;  %v2427_v15 = vadd.s32 %v2402_v36, %v844_v5  ;;  %p2160_p1 = scmp.lt.s32.totalorder %s2158_s10, %s2152_s6 }
  0x2c   : > { %1955 = vmatmul.mubr.msk.f32.gmra.mrb[6].mxu1 %vm255_vm1, %v234_v16  ;;  %1933 = vmatprep.mubr.msk.f32.mxu0 %vm255_vm1, %v219_v17  ;;  %v843_v16 = vadd.s32 32, %v2398_v34  ;;  %v2430_v17 = vsub.f32 %v904_v47, %v1001_v6 }
  0x2d   : > { %1957 = vmatprep.mubr.msk.f32.mxu1 %vm255_vm1, %v235_v18  ;;  %v1004_v18 = vmul.f32 256.0, %v972_v7  ;;  %p2161_p2 = por %p2160_p1, %p2159_p0 }
  0x2f   : > { %1934 = vmatmul.mubr.msk.f32.gmra.mrb[8].mxu0 %vm255_vm1, %v220_v19  ;;  %v859_v19 = vadd.s32 160, %v2398_v34  ;;  %p2162_p3 = pnand %p2161_p2, %p2155_p13 }
  0x30   : > { %1958 = vmatmul.mubr.msk.f32.gmra.mrb[8].mxu1 %vm255_vm1, %v236_v20  ;;  %1936 = vmatprep.mubr.msk.f32.mxu0 %vm255_vm1, %v221_v21  ;;  %v1083_v20 = vmul.f32 0.0625, %v2422_v8  ;;  %v988_v21 = vfloor.f32 %v956_v9 }
  0x31   : > { %1960 = vmatprep.mubr.msk.f32.mxu1 %vm255_vm1, %v237_v22  ;;  %v939_v22 = vmul.f32 0.00390625, %v906_v10 }
  0x32   : > { %v1020_v33 = vmul.f32 256.0, %v988_v21 }
  0x33   : > { %1937 = vmatmul.mubr.msk.f32.gmra.mrb[10].mxu0 %vm255_vm1, %v222_v23  ;;  %v955_v23 = vmul.f32 0.00390625, %v922_v11  ;;  %v971_v35 = vfloor.f32 %v939_v22  ;;  %v845_v22 = vadd.s32 48, %v2398_v34 }
  0x34   : > { %1961 = vmatmul.mubr.msk.f32.gmra.mrb[10].mxu1 %vm255_vm1, %v238_v24  ;;  %1939 = vmatprep.mubr.msk.f32.mxu0 %vm255_vm1, %v223_v25  ;;  %v2434_v24 = vsub.f32 %v920_v51, %v1017_v12  ;;  %v2437_v25 = vadd.s32 %v2402_v36, %v860_v13  ;;  %v2457_v47 = vsub.f32 %v923_v0, %v1020_v33 }
  0x35   : > { %1963 = vmatprep.mubr.msk.f32.mxu1 %vm255_vm1, %v239_v26  ;;  %v1099_v26 = vfloor.f32 %v1067_v14  ;;  %v987_v37 = vfloor.f32 %v955_v23  ;;  %v1003_v48 = vmul.f32 256.0, %v971_v35 }
  0x36   : > { %v1082_v38 = vmul.f32 0.0625, %v2434_v24  ;;  %v925_v39 = vcvt.s32.f32 %v2437_v25  ;;  %v2473_v62 = vmul.f32 0.0625, %v2457_v47 }
  0x37   : > { %1940 = vmatmul.mubr.msk.f32.gmra.mrb[12].mxu0 %vm255_vm1, %v224_v27  ;;  %v909_v27 = vcvt.s32.f32 %v2427_v15  ;;  %v1131_v40 = vmul.f32 16.0, %v1099_v26  ;;  %v1019_v49 = vmul.f32 256.0, %v987_v37  ;;  %v2475_v63 = vsub.f32 %v906_v10, %v1003_v48 }
  0x38   : > { %1964 = vmatmul.mubr.msk.f32.gmra.mrb[12].mxu1 %vm255_vm1, %v240_v28  ;;  %1942 = vmatprep.mubr.msk.f32.mxu0 %vm255_vm1, %v225_v29  ;;  %v2441_v28 = vadd.s32 %v2402_v36, %v843_v16  ;;  %v2444_v29 = vmul.f32 0.0625, %v2430_v17  ;;  %v1114_v50 = vfloor.f32 %v1082_v38  ;;  %v958_v51 = vmul.f32 0.00390625, %v925_v39 }
  0x39   : > { %1966 = vmatprep.mubr.msk.f32.mxu1 %vm255_vm1, %v241_v30  ;;  %v2446_v30 = vsub.f32 %v907_v54, %v1004_v18  ;;  %v942_v41 = vmul.f32 0.00390625, %v909_v27  ;;  %v1163_v53 = vsub.f32 %v2419_v4, %v1131_v40  ;;  %v2477_v0 = vsub.f32 %v922_v11, %v1019_v49 }
  0x3a   : > { %v908_v42 = vcvt.s32.f32 %v2441_v28  ;;  %v1098_v43 = vfloor.f32 %v2444_v29  ;;  %v1146_v1 = vmul.f32 16.0, %v1114_v50  ;;  %v990_v2 = vfloor.f32 %v958_v51 }
  0x3b   : > { %1943 = vmatmul.mubr.msk.f32.gmra.mrb[14].mxu0 %vm255_vm1, %v226_v31  ;;  %v2449_v31 = vadd.s32 %v2402_v36, %v859_v19  ;;  %v1069_v44 = vmul.f32 0.0625, %v2446_v30  ;;  %v974_v54 = vfloor.f32 %v942_v41  ;;  %v1199_v4 = vmul.f32 %v2464_v56, %v1163_v53 }
  0x3c   : > { %1967 = vmatmul.mubr.msk.f32.gmra.mrb[14].mxu1 %vm255_vm1, %v242_v32  ;;  %v1115_v32 = vfloor.f32 %v1083_v20  ;;  %v941_v55 = vmul.f32 0.00390625, %v908_v42  ;;  %v1130_v57 = vmul.f32 16.0, %v1098_v43  ;;  %v1235_v7 = vmul.f32 %v2469_v60, %v1099_v26 }
  0x3d   : > { %v924_v45 = vcvt.s32.f32 %v2449_v31  ;;  %v1101_v58 = vfloor.f32 %v1069_v44  ;;  %v1006_v5 = vmul.f32 256.0, %v974_v54  ;;  %v1117_v11 = vfloor.f32 %v2473_v62 }
  0x3e   : > { %v1147_v46 = vmul.f32 16.0, %v1115_v32  ;;  %v973_v6 = vfloor.f32 %v941_v55  ;;  %v1068_v13 = vmul.f32 0.0625, %v2475_v63  ;;  %v1084_v14 = vmul.f32 0.0625, %v2477_v0 }
  0x3f   : > { %v957_v59 = vmul.f32 0.00390625, %v924_v45  ;;  %v1133_v9 = vmul.f32 16.0, %v1101_v58  ;;  %v1178_v15 = vsub.f32 %v2434_v24, %v1146_v1  ;;  %v1022_v16 = vmul.f32 256.0, %v990_v2 }
  0x40   : > { %v1179_v61 = vsub.f32 %v2422_v8, %v1147_v46  ;;  %v1162_v8 = vsub.f32 %v2430_v17, %v1130_v57  ;;  %v911_v18 = vcvt.s32.f32 %v2480_v3  ;;  %v862_v19 = vadd.s32 184, %v2398_v34 }
  0x41   : > { %v989_v12 = vfloor.f32 %v957_v59  ;;  %v1251_v20 = vmul.f32 %v2469_v60, %v1115_v32  ;;  %v2493_v17 = vsub.f32 %v909_v27, %v1006_v5  ;;  %v1005_v21 = vmul.f32 256.0, %v973_v6 }
  0x42   : > { %v1215_v10 = vmul.f32 %v2464_v56, %v1179_v61  ;;  %v2496_v23 = vadd.f32 %v1235_v7, %v1199_v4  ;;  %v1198_v25 = vmul.f32 %v2464_v56, %v1162_v8  ;;  %v1165_v26 = vsub.f32 %v2446_v30, %v1133_v9 }
  0x43   : > { %v1021_v28 = vmul.f32 256.0, %v989_v12  ;;  %v1149_v24 = vmul.f32 16.0, %v1117_v11  ;;  %v1100_v29 = vfloor.f32 %v1068_v13  ;;  %v1116_v31 = vfloor.f32 %v1084_v14 }
  0x44   : > { %v2501_v33 = vadd.s32 %v2402_v36, %v862_v19  ;;  %v1234_v32 = vmul.f32 %v2469_v60, %v1098_v43  ;;  %v1214_v27 = vmul.f32 %v2464_v56, %v1178_v15  ;;  %v2505_v35 = vsub.f32 %v925_v39, %v1022_v16 }
  0x45   : > { %v944_v37 = vmul.f32 0.00390625, %v911_v18  ;;  %v1250_v38 = vmul.f32 %v2469_v60, %v1114_v50  ;;  %v2511_v30 = vmul.f32 0.0625, %v2493_v17  ;;  %v2513_v40 = vsub.f32 %v908_v42, %v1005_v21 }
  0x46   : > { %v2516_v41 = vadd.s32 %v2402_v36, %v845_v22  ;;  %v1201_v44 = vmul.f32 %v2464_v56, %v1165_v26  ;;  %v1237_v43 = vmul.f32 %v2469_v60, %v1101_v58  ;;  %v2520_v46 = vsub.f32 %v924_v45, %v1021_v28 }
  0x47   : > { %v861_v39 = vadd.s32 176, %v2398_v34  ;;  %v1181_v48 = vsub.f32 %v2457_v47, %v1149_v24  ;;  %v1132_v49 = vmul.f32 16.0, %v1100_v29  ;;  %v1148_v50 = vmul.f32 16.0, %v1116_v31 }
  0x48   : > { %v927_v51 = vcvt.s32.f32 %v2501_v33  ;;  %v2525_v52 = vadd.f32 %v1251_v20, %v1215_v10  ;;  %v1087_v42 = vmul.f32 0.0625, %v2505_v35  ;;  %v976_v53 = vfloor.f32 %v944_v37 }
  0x49   : > { %v848_v54 = vadd.s32 72, %v2398_v34  ;;  %v2529_v55 = vadd.f32 %v1234_v32, %v1198_v25  ;;  %v1103_v45 = vfloor.f32 %v2511_v30  ;;  %v1070_v57 = vmul.f32 0.0625, %v2513_v40 }
  0x4a   : > { %v910_v58 = vcvt.s32.f32 %v2516_v41  ;;  %v2534_v47 = vadd.f32 %v1250_v38, %v1214_v27  ;;  %v2536_v59 = vadd.f32 %v1237_v43, %v1201_v44  ;;  %v1086_v61 = vmul.f32 0.0625, %v2520_v46 }
  0x4b   : > { %v2540_v62 = vadd.s32 %v2402_v36, %v861_v39  ;;  %v1217_v1 = vmul.f32 %v2464_v56, %v1181_v48  ;;  %v1164_v2 = vsub.f32 %v2475_v63, %v1132_v49  ;;  %v1180_v4 = vsub.f32 %v2477_v0, %v1148_v50 }
  0x4c   : > { %v960_v5 = vmul.f32 0.00390625, %v927_v51  ;;  %v1253_v6 = vmul.f32 %v2469_v60, %v1117_v11  ;;  %v1119_v7 = vfloor.f32 %v1087_v42  ;;  %v1008_v8 = vmul.f32 256.0, %v976_v53 }
  0x4d   : > { %v2549_v9 = vadd.s32 %v2402_v36, %v848_v54  ;;  %v1236_v12 = vmul.f32 %v2469_v60, %v1100_v29  ;;  %v1135_v10 = vmul.f32 16.0, %v1103_v45  ;;  %v1102_v13 = vfloor.f32 %v1070_v57 }
  0x4e   : > { %v943_v14 = vmul.f32 0.00390625, %v910_v58  ;;  %v1252_v63 = vmul.f32 %v2469_v60, %v1116_v31  ;;  %v1118_v0 = vfloor.f32 %v1086_v61  ;;  %v926_v15 = vcvt.s32.f32 %v2540_v62 }
  0x4f   : > { %v864_v16 = vadd.s32 200, %v2398_v34  ;;  %v1200_v11 = vmul.f32 %v2464_v56, %v1164_v2  ;;  %v1216_v19 = vmul.f32 %v2464_v56, %v1180_v4  ;;  %v992_v20 = vfloor.f32 %v960_v5 }
  0x50   : > { %v847_v21 = vadd.s32 64, %v2398_v34  ;;  %v1151_v22 = vmul.f32 16.0, %v1119_v7  ;;  %v2562_v25 = vsub.f32 %v911_v18, %v1008_v8  ;;  %v913_v26 = vcvt.s32.f32 %v2549_v9 }
  0x51   : > { %v863_v28 = vadd.s32 192, %v2398_v34  ;;  %v2566_v24 = vadd.f32 %v1253_v6, %v1217_v1  ;;  %v1167_v29 = vsub.f32 %v2493_v17, %v1135_v10  ;;  %v1134_v31 = vmul.f32 16.0, %v1102_v13 }
  0x52   : > { %v975_v32 = vfloor.f32 %v943_v14  ;;  %v1150_v27 = vmul.f32 16.0, %v1118_v0  ;;  %v959_v37 = vmul.f32 0.00390625, %v926_v15  ;;  %v2572_v38 = vadd.s32 %v2402_v36, %v864_v16 }
  0x53   : > { %v850_v3 = vadd.s32 88, %v2398_v34  ;;  %v2575_v18 = vadd.f32 %v1236_v12, %v1200_v11  ;;  %v2577_v30 = vadd.f32 %v1252_v63, %v1216_v19  ;;  %v1024_v44 = vmul.f32 256.0, %v992_v20 }
  0x54   : > { %v2580_v43 = vadd.s32 %v2402_v36, %v847_v21  ;;  %v1183_v17 = vsub.f32 %v2505_v35, %v1151_v22  ;;  %v2584_v39 = vmul.f32 0.0625, %v2562_v25  ;;  %v946_v48 = vmul.f32 0.00390625, %v913_v26 }
  0x55   : > { %v2587_v49 = vadd.s32 %v2402_v36, %v863_v28  ;;  %v1203_v50 = vmul.f32 %v2464_v56, %v1167_v29  ;;  %v1239_v42 = vmul.f32 %v2469_v60, %v1103_v45  ;;  %v1166_v53 = vsub.f32 %v2513_v40, %v1134_v31 }
  0x56   : > { %v1007_v54 = vmul.f32 256.0, %v975_v32  ;;  %v1182_v57 = vsub.f32 %v2520_v46, %v1150_v27  ;;  %v991_v61 = vfloor.f32 %v959_v37  ;;  %v929_v1 = vcvt.s32.f32 %v2572_v38 }
  0x57   : > { %v2595_v35 = vadd.s32 %v2402_v36, %v850_v3  ;;  %v1255_v2 = vmul.f32 %v2469_v60, %v1119_v7  ;;  %v1238_v4 = vmul.f32 %v2469_v60, %v1102_v13  ;;  %v2601_v5 = vsub.f32 %v927_v51, %v1024_v44 }
  0x58   : > { %v912_v45 = vcvt.s32.f32 %v2580_v43  ;;  %v1219_v40 = vmul.f32 %v2464_v56, %v1183_v17  ;;  %v1105_v46 = vfloor.f32 %v2584_v39  ;;  %v978_v6 = vfloor.f32 %v946_v48 }
  0x59   : > { %v928_v8 = vcvt.s32.f32 %v2587_v49  ;;  %v2607_v9 = vadd.f32 %v1239_v42, %v1203_v50  ;;  %v1202_v12 = vmul.f32 %v2464_v56, %v1166_v53  ;;  %v1254_v7 = vmul.f32 %v2469_v60, %v1118_v0 }
  0x5a   : > { %v2613_v33 = vsub.f32 %v910_v58, %v1007_v54  ;;  %v1218_v51 = vmul.f32 %v2464_v56, %v1182_v57  ;;  %v1023_v10 = vmul.f32 256.0, %v991_v61  ;;  %v962_v13 = vmul.f32 0.00390625, %v929_v1 }
  0x5b   : > { %v915_v14 = vcvt.s32.f32 %v2595_v35  ;;  %v2620_v63 = vmul.f32 0.0625, %v2601_v5  ;;  %v945_v16 = vmul.f32 0.00390625, %v912_v45  ;;  %v866_v0 = vadd.s32 216, %v2398_v34 }
  0x5c   : > { %v849_v41 = vadd.s32 80, %v2398_v34  ;;  %v2626_v58 = vadd.f32 %v1255_v2, %v1219_v40  ;;  %v1137_v11 = vmul.f32 16.0, %v1105_v46  ;;  %v1010_v19 = vmul.f32 256.0, %v978_v6 }
  0x5d   : > { %v961_v20 = vmul.f32 0.00390625, %v928_v8  ;;  %v2631_v21 = vmul.f32 0.0625, %v2613_v33  ;;  %v948_v22 = vmul.f32 0.00390625, %v915_v14  ;;  %v899_v28 = vadd.s32 %v2402_v36, %v866_v0 }
  0x5e   : > { %v882_v29 = vadd.s32 %v2402_v36, %v849_v41  ;;  %v2635_v31 = vadd.f32 %v1238_v4, %v1202_v12  ;;  %v2637_v32 = vadd.f32 %v1254_v7, %v1218_v51  ;;  %v2641_v27 = vsub.f32 %v926_v15, %v1023_v10 }
  0x5f   : > { %v994_v37 = vfloor.f32 %v962_v13  ;;  %v1121_v3 = vfloor.f32 %v2620_v63  ;;  %v977_v44 = vfloor.f32 %v945_v16  ;;  %v931_v17 = vcvt.s32.f32 %v899_v28 }
  0x60   : > { %v914_v39 = vcvt.s32.f32 %v882_v29  ;;  %v2644_v48 = vsub.f32 %v913_v26, %v1010_v19  ;;  %v993_v50 = vfloor.f32 %v961_v20  ;;  %v865_v42 = vadd.s32 208, %v2398_v34 }
  0x61   : > { %v852_v53 = vadd.s32 104, %v2398_v34  ;;  %v1169_v54 = vsub.f32 %v2562_v25, %v1137_v11  ;;  %v1104_v57 = vfloor.f32 %v2631_v21  ;;  %v980_v62 = vfloor.f32 %v948_v22 }
  0x62   : > { %v964_v15 = vmul.f32 0.00390625, %v931_v17  ;;  %v1026_v61 = vmul.f32 256.0, %v994_v37  ;;  %v947_v35 = vmul.f32 0.00390625, %v914_v39  ;;  %v898_v2 = vadd.s32 %v2402_v36, %v865_v42 }
  0x63   : > { %v885_v4 = vadd.s32 %v2402_v36, %v852_v53  ;;  %v1153_v40 = vmul.f32 16.0, %v1121_v3  ;;  %v2653_v26 = vmul.f32 0.0625, %v2641_v27  ;;  %v1009_v6 = vmul.f32 256.0, %v977_v44 }
  0x64   : > { %v996_v12 = vfloor.f32 %v964_v15  ;;  %v2656_v7 = vmul.f32 0.0625, %v2644_v48  ;;  %v1025_v25 = vmul.f32 256.0, %v993_v50  ;;  %v979_v51 = vfloor.f32 %v947_v35 }
  0x65   : > { %v930_v10 = vcvt.s32.f32 %v898_v2  ;;  %v1136_v13 = vmul.f32 16.0, %v1104_v57  ;;  %v1012_v63 = vmul.f32 256.0, %v980_v62  ;;  %v917_v0 = vcvt.s32.f32 %v885_v4 }
  0x66   : > { %v1028_v16 = vmul.f32 256.0, %v996_v12  ;;  %v2661_v41 = vmul.f32 %v2469_v60, %v1105_v46  ;;  %v2665_v11 = vsub.f32 %v929_v1, %v1026_v61  ;;  %v1011_v19 = vmul.f32 256.0, %v979_v51 }
  0x67   : > { %v963_v20 = vmul.f32 0.00390625, %v930_v10  ;;  %v1185_v22 = vsub.f32 %v2601_v5, %v1153_v40  ;;  %v1120_v28 = vfloor.f32 %v2653_v26  ;;  %v2671_v29 = vsub.f32 %v912_v45, %v1009_v6 }
  0x68   : > { %v950_v37 = vmul.f32 0.00390625, %v917_v0  ;;  %v1205_v44 = vmul.f32 %v2464_v56, %v1169_v54  ;;  %v1107_v46 = vfloor.f32 %v2656_v7  ;;  %v2677_v38 = vsub.f32 %v928_v8, %v1025_v25 }
  0x69   : > { %v995_v1 = vfloor.f32 %v963_v20  ;;  %v1168_v50 = vsub.f32 %v2613_v33, %v1136_v13  ;;  %v2680_v42 = vsub.f32 %v915_v14, %v1012_v63  ;;  %v2682_v5 = vsub.f32 %v931_v17, %v1028_v16 }
  0x6a   : > { %v982_v53 = vfloor.f32 %v950_v37  ;;  %v2685_v43 = vmul.f32 0.0625, %v2665_v11  ;;  %v2687_v45 = vsub.f32 %v914_v39, %v1011_v19  ;;  %v868_v62 = vadd.s32 232, %v2398_v34 }
  0x6b   : > { %v1027_v54 = vmul.f32 256.0, %v995_v1  ;;  %v1221_v49 = vmul.f32 %v2464_v56, %v1185_v22  ;;  %v1152_v8 = vmul.f32 16.0, %v1120_v28  ;;  %v2692_v15 = vmul.f32 0.0625, %v2671_v29 }
  0x6c   : > { %v1014_v33 = vmul.f32 256.0, %v982_v53  ;;  %v1139_v14 = vmul.f32 16.0, %v1107_v46  ;;  %v2695_v17 = vmul.f32 0.0625, %v2677_v38  ;;  %v901_v35 = vadd.s32 %v2402_v36, %v868_v62 }
  0x6d   : > { %v2697_v61 = vsub.f32 %v930_v10, %v1027_v54  ;;  %v1257_v39 = vmul.f32 %v2469_v60, %v1121_v3  ;;  %v2702_v2 = vmul.f32 0.0625, %v2680_v42  ;;  %v2705_v4 = vmul.f32 0.0625, %v2682_v5 }
  0x6e   : > { %v2707_v40 = vsub.f32 %v917_v0, %v1014_v33  ;;  %v1123_v26 = vfloor.f32 %v2685_v43  ;;  %v2711_v6 = vmul.f32 0.0625, %v2687_v45  ;;  %v933_v7 = vcvt.s32.f32 %v901_v35 }
  0x6f   : > { %v2714_v12 = vmul.f32 0.0625, %v2697_v61  ;;  %v1184_v25 = vsub.f32 %v2641_v27, %v1152_v8  ;;  %v1106_v3 = vfloor.f32 %v2692_v15  ;;  %v851_v10 = vadd.s32 96, %v2398_v34 }
  0x70   : > { %v2719_v51 = vmul.f32 0.0625, %v2707_v40  ;;  %v1204_v13 = vmul.f32 %v2464_v56, %v1168_v50  ;;  %v1171_v63 = vsub.f32 %v2644_v48, %v1139_v14  ;;  %v1122_v16 = vfloor.f32 %v2695_v17 }
  0x71   : > { %v966_v0 = vmul.f32 0.00390625, %v933_v7  ;;  %v1240_v19 = vmul.f32 %v2469_v60, %v1104_v57  ;;  %v1109_v27 = vfloor.f32 %v2702_v2  ;;  %v1125_v20 = vfloor.f32 %v2705_v4 }
  0x72   : > { %v884_v22 = vadd.s32 %v2402_v36, %v851_v10  ;;  %v1155_v37 = vmul.f32 16.0, %v1123_v26  ;;  %v1108_v1 = vfloor.f32 %v2711_v6  ;;  %v1124_v50 = vfloor.f32 %v2714_v12 }
  0x73   : > { %v998_v53 = vfloor.f32 %v966_v0  ;;  %v1220_v48 = vmul.f32 %v2464_v56, %v1184_v25  ;;  %v1138_v43 = vmul.f32 16.0, %v1106_v3  ;;  %v1111_v54 = vfloor.f32 %v2719_v51 }
  0x74   : > { %v916_v21 = vcvt.s32.f32 %v884_v22  ;;  %v1256_v57 = vmul.f32 %v2469_v60, %v1120_v28  ;;  %v1207_v62 = vmul.f32 %v2464_v56, %v1171_v63  ;;  %v1154_v8 = vmul.f32 16.0, %v1122_v16 }
  0x75   : > { %v1030_v15 = vmul.f32 256.0, %v998_v53  ;;  %v1243_v33 = vmul.f32 %v2469_v60, %v1107_v46  ;;  %v1141_v14 = vmul.f32 16.0, %v1109_v27  ;;  %v1157_v17 = vmul.f32 16.0, %v1125_v20 }
  0x76   : > { %v949_v35 = vmul.f32 0.00390625, %v916_v21  ;;  %v1187_v2 = vsub.f32 %v2665_v11, %v1155_v37  ;;  %v1140_v4 = vmul.f32 16.0, %v1108_v1  ;;  %v1156_v6 = vmul.f32 16.0, %v1124_v50 }
  0x77   : > { %v2739_v12 = vsub.f32 %v933_v7, %v1030_v15  ;;  %v2742_v25 = vadd.f32 %v2661_v41, %v1205_v44  ;;  %v1170_v28 = vsub.f32 %v2671_v29, %v1138_v43  ;;  %v1143_v51 = vmul.f32 16.0, %v1111_v54 }
  0x78   : > { %v981_v10 = vfloor.f32 %v949_v35  ;;  %v2745_v63 = vadd.f32 %v1257_v39, %v1221_v49  ;;  %v2747_v46 = vadd.f32 %v1240_v19, %v1204_v13  ;;  %v1186_v0 = vsub.f32 %v2677_v38, %v1154_v8  ;;  %v2785_v8 = vld [vmem:[%s3470_s2] ss:$0 sm:$0xff] }
  0x79   : > { %3489 = vst [vmem:[#allocation10_spill] sm:$0xff] %v2742_v25  ;;  %v2751_v11 = vmul.f32 0.0625, %v2739_v12  ;;  %v2753_v22 = vadd.f32 %v1256_v57, %v1220_v48  ;;  %v2755_v7 = vadd.f32 %v1243_v33, %v1207_v62  ;;  %v1173_v41 = vsub.f32 %v2680_v42, %v1141_v14 }
  0x7a   : > { %3490 = vst [vmem:[#allocation11_spill] sm:$0xff] %v2745_v63  ;;  %3491 = vst [vmem:[#allocation12_spill] sm:$0xff] %v2747_v46  ;;  %v1189_v44 = vsub.f32 %v2682_v5, %v1157_v17  ;;  %v1223_v29 = vmul.f32 %v2464_v56, %v1187_v2  ;;  %v1259_v49 = vmul.f32 %v2469_v60, %v1123_v26  ;;  %v1013_v42 = vmul.f32 256.0, %v981_v10 }
  0x7b   : > { %3492 = vst [vmem:[#allocation13_spill] sm:$0xff] %v2753_v22  ;;  %3493 = vst [vmem:[#allocation14_spill] sm:$0xff] %v2755_v7  ;;  %v1172_v39 = vsub.f32 %v2687_v45, %v1140_v4  ;;  %v1188_v13 = vsub.f32 %v2697_v61, %v1156_v6  ;;  %v1206_v38 = vmul.f32 %v2464_v56, %v1170_v28  ;;  %v3475_v26 = vfloor.f32 %v2751_v11 }
  0x7c   : > { %v1242_v19 = vmul.f32 %v2469_v60, %v1106_v3  ;;  %v1175_v37 = vsub.f32 %v2707_v40, %v1143_v51  ;;  %v1222_v5 = vmul.f32 %v2464_v56, %v1186_v0  ;;  %v1258_v53 = vmul.f32 %v2469_v60, %v1122_v16 }
  0x7d   : > { %v867_v45 = vadd.s32 224, %v2398_v34  ;;  %v1209_v61 = vmul.f32 %v2464_v56, %v1173_v41  ;;  %v1245_v48 = vmul.f32 %v2469_v60, %v1109_v27  ;;  %v1225_v43 = vmul.f32 %v2464_v56, %v1189_v44 }
  0x7e   : > { %v1261_v57 = vmul.f32 %v2469_v60, %v1125_v20  ;;  %v1208_v40 = vmul.f32 %v2464_v56, %v1172_v39  ;;  %v1244_v3 = vmul.f32 %v2469_v60, %v1108_v1  ;;  %v1224_v62 = vmul.f32 %v2464_v56, %v1188_v13 }
  0x7f   : > { %v1260_v16 = vmul.f32 %v2469_v60, %v1124_v50  ;;  %v2787_v15 = vadd.f32 %v1259_v49, %v1223_v29  ;;  %v1211_v27 = vmul.f32 %v2464_v56, %v1175_v37  ;;  %v1247_v20 = vmul.f32 %v2469_v60, %v1111_v54 }
  0x80   : > { %v2791_v33 = vsub.f32 %v916_v21, %v1013_v42  ;;  %v2793_v14 = vadd.f32 %v1242_v19, %v1206_v38  ;;  %v2795_v1 = vadd.f32 %v1258_v53, %v1222_v5  ;;  %v2799_v50 = vmul.f32 16.0, %v3475_v26 }
  0x81   : > { %3494 = vst [vmem:[#allocation15_spill] sm:$0xff] %v2787_v15  ;;  %v2802_v17 = vadd.s32 %v2402_v36, %v867_v45  ;;  %v2804_v4 = vadd.f32 %v1245_v48, %v1209_v61  ;;  %v2806_v6 = vadd.f32 %v1261_v57, %v1225_v43  ;;  %v854_v60 = vadd.s32 120, %v2398_v34 }
  0x82   : > { %3495 = vst [vmem:[#allocation16_spill] sm:$0xff] %v2791_v33  ;;  %3496 = vst [vmem:[#allocation17_spill] sm:$0xff] %v2793_v14  ;;  %v870_v54 = vadd.s32 248, %v2398_v34  ;;  %v2812_v0 = vadd.f32 %v1244_v3, %v1208_v40  ;;  %v2814_v41 = vadd.f32 %v1260_v16, %v1224_v62  ;;  %v2818_v49 = vadd.f32 %v1247_v20, %v1211_v27 }
  0x83   : > { %3497 = vst [vmem:[#allocation18_spill] sm:$0xff] %v2795_v1  ;;  %3498 = vst [vmem:[#allocation19_spill] sm:$0xff] %v2802_v17  ;;  %v2821_v39 = vmul.f32 0.0625, %v2791_v33  ;;  %v1191_v19 = vsub.f32 %v2739_v12, %v2799_v50  ;;  %v3473_v37 = vcvt.s32.f32 %v2802_v17  ;;  %v2835_v61 = vadd.s32 %v2402_v36, %v854_v60 }
  0x84   : > { %3499 = vst [vmem:[#allocation20_spill] sm:$0xff] %v2804_v4  ;;  %3500 = vst [vmem:[#allocation21_spill] sm:$0xff] %v2806_v6  ;;  %v2838_v48 = vadd.s32 %v2402_v36, %v870_v54 }
  0x85   : > { %3501 = vst [vmem:[#allocation22_spill] sm:$0xff] %v2812_v0  ;;  %3502 = vst [vmem:[#allocation23_spill] sm:$0xff] %v2814_v41 }
  0x86   : > { %3503 = vst [vmem:[#allocation24_spill] sm:$0xff] %v2818_v49  ;;  %3504 = vst [vmem:[#allocation25_spill] sm:$0xff] %v2835_v61 }
  0xf2   : > { %v1923_v35 = vpop.f32.mrb[0].mxu0 }
  0xf3   : > { %v1947_v2 = vpop.f32.mrb[0].mxu1  ;;  %v428_v21 = vadd.f32 %v1923_v35, %v2785_v8  ;;  %v422_v51 = vpop.f32.mrb[1].mxu0 }
  0xf4   : > { %v508_v28 = vadd.f32 %v1947_v2, %v2785_v8  ;;  %v502_v10 = vpop.f32.mrb[1].mxu1  ;;  %v423_v44 = vadd.f32 %v2785_v8, %v422_v51 }
  0xf5   : > { %v503_v29 = vadd.f32 %v2785_v8, %v502_v10  ;;  %582 = vst [vmem:[%s2825_s23 + $0x8] sm:$0xff] %v428_v21  ;;  %v614_v13 = vsub.f32 0.0, %v428_v21  ;;  %v2847_v21 = vadd.s32 112, %v2398_v34 }
  0xf6   : > { %598 = vst [vmem:[%s2825_s23 + $0x88] sm:$0xff] %v508_v28  ;;  %v630_v38 = vsub.f32 0.0, %v508_v28  ;;  %581 = vst [vmem:[%s2825_s23] sm:$0xff] %v423_v44  ;;  %v613_v42 = vsub.f32 0.0, %v423_v44  ;;  %v1926_v53 = vpop.f32.mrb[2].mxu0 }
  0xf7   : > { %597 = vst [vmem:[%s2825_s23 + $0x80] sm:$0xff] %v503_v29  ;;  %v629_v5 = vsub.f32 0.0, %v503_v29  ;;  %v1950_v45 = vpop.f32.mrb[2].mxu1  ;;  %v647_v43 = vmul.f32 1.442695, %v614_v13  ;;  %v438_v40 = vadd.f32 %v1926_v53, %v2785_v8  ;;  %v432_v62 = vpop.f32.mrb[3].mxu0 }
  0xf8   : > { %v679_v57 = vmul.f32 1.442695, %v630_v38  ;;  %v518_v3 = vadd.f32 %v1950_v45, %v2785_v8  ;;  %v512_v16 = vpop.f32.mrb[3].mxu1  ;;  %v645_v27 = vmul.f32 1.442695, %v613_v42  ;;  %v433_v35 = vadd.f32 %v2785_v8, %v432_v62  ;;  %3505 = vst [vmem:[#allocation26_spill] sm:$0xff] %v2847_v21 }
  0xf9   : > { %v677_v20 = vmul.f32 1.442695, %v629_v5  ;;  %v513_v2 = vadd.f32 %v2785_v8, %v512_v16  ;;  %2017 = vpow2.f32 %v647_v43  ;;  %584 = vst [vmem:[%s2825_s23 + $0x18] sm:$0xff] %v438_v40  ;;  %v616_v60 = vsub.f32 0.0, %v438_v40 }
  0xfa   : > { %600 = vst [vmem:[%s2825_s23 + $0x98] sm:$0xff] %v518_v3  ;;  %v632_v54 = vsub.f32 0.0, %v518_v3  ;;  %2019 = vpow2.f32 %v679_v57  ;;  %583 = vst [vmem:[%s2825_s23 + $0x10] sm:$0xff] %v433_v35  ;;  %v615_v28 = vsub.f32 0.0, %v433_v35  ;;  %v1929_v10 = vpop.f32.mrb[4].mxu0 }
  0xfb   : > { %599 = vst [vmem:[%s2825_s23 + $0x90] sm:$0xff] %v513_v2  ;;  %v631_v51 = vsub.f32 0.0, %v513_v2  ;;  %v1953_v44 = vpop.f32.mrb[4].mxu1  ;;  %2021 = vpow2.f32 %v645_v27  ;;  %v651_v13 = vmul.f32 1.442695, %v616_v60  ;;  %v448_v42 = vadd.f32 %v1929_v10, %v2785_v8  ;;  %v442_v5 = vpop.f32.mrb[5].mxu0 }
  0xfc   : > { %v683_v38 = vmul.f32 1.442695, %v632_v54  ;;  %v522_v53 = vpop.f32.mrb[5].mxu1  ;;  %2023 = vpow2.f32 %v677_v20  ;;  %v649_v45 = vmul.f32 1.442695, %v615_v28  ;;  %v528_v57 = vadd.f32 %v1953_v44, %v2785_v8 }
  0xfd   : > { %v681_v43 = vmul.f32 1.442695, %v631_v51  ;;  %2025 = vpow2.f32 %v651_v13  ;;  %586 = vst [vmem:[%s2825_s23 + $0x28] sm:$0xff] %v448_v42  ;;  %v618_v40 = vsub.f32 0.0, %v448_v42  ;;  %v443_v3 = vadd.f32 %v2785_v8, %v442_v5 }
  0xfe   : > { %v523_v62 = vadd.f32 %v2785_v8, %v522_v53  ;;  %2027 = vpow2.f32 %v683_v38  ;;  %602 = vst [vmem:[%s2825_s23 + $0xa8] sm:$0xff] %v528_v57  ;;  %v634_v16 = vsub.f32 0.0, %v528_v57  ;;  %v1932_v27 = vpop.f32.mrb[6].mxu0  ;;  %v2860_v20 = vmul.f32 0.00390625, %v3473_v37 }
  0xff   : > { %v1956_v35 = vpop.f32.mrb[6].mxu1  ;;  %v3474_v2 = vcvt.s32.f32 %v2835_v61  ;;  %2029 = vpow2.f32 %v649_v45  ;;  %v655_v60 = vmul.f32 1.442695, %v618_v40  ;;  %585 = vst [vmem:[%s2825_s23 + $0x20] sm:$0xff] %v443_v3  ;;  %v617_v54 = vsub.f32 0.0, %v443_v3  ;;  %v452_v51 = vpop.f32.mrb[7].mxu0 }
 0x100   : > { %601 = vst [vmem:[%s2825_s23 + $0xa0] sm:$0xff] %v523_v62  ;;  %v633_v28 = vsub.f32 0.0, %v523_v62  ;;  %v532_v10 = vpop.f32.mrb[7].mxu1  ;;  %2031 = vpow2.f32 %v681_v43  ;;  %v687_v44 = vmul.f32 1.442695, %v634_v16  ;;  %v458_v13 = vadd.f32 %v1932_v27, %v2785_v8 }
 0x101   : > { %v538_v38 = vadd.f32 %v1956_v35, %v2785_v8  ;;  %2033 = vpow2.f32 %v655_v60  ;;  %v653_v42 = vmul.f32 1.442695, %v617_v54  ;;  %v453_v53 = vadd.f32 %v2785_v8, %v452_v51 }
 0x102   : > { %v685_v5 = vmul.f32 1.442695, %v633_v28  ;;  %2035 = vpow2.f32 %v687_v44  ;;  %588 = vst [vmem:[%s2825_s23 + $0x38] sm:$0xff] %v458_v13  ;;  %v620_v45 = vsub.f32 0.0, %v458_v13  ;;  %v533_v57 = vadd.f32 %v2785_v8, %v532_v10  ;;  %v1935_v40 = vpop.f32.mrb[8].mxu0 }
 0x103   : > { %604 = vst [vmem:[%s2825_s23 + $0xb8] sm:$0xff] %v538_v38  ;;  %v1959_v43 = vpop.f32.mrb[8].mxu1  ;;  %v2875_v3 = vmul.f32 %v2464_v56, %v1191_v19  ;;  %v2018_v62 = vpop.eup %2017  ;;  %2037 = vpow2.f32 %v653_v42  ;;  %v636_v16 = vsub.f32 0.0, %v538_v38  ;;  %587 = vst [vmem:[%s2825_s23 + $0x30] sm:$0xff] %v453_v53  ;;  %v468_v27 = vadd.f32 %v1935_v40, %v2785_v8 }
 0x104   : > { %v548_v35 = vadd.f32 %v1959_v43, %v2785_v8  ;;  %v462_v60 = vpop.f32.mrb[9].mxu0  ;;  %v542_v54 = vpop.f32.mrb[9].mxu1  ;;  %v710_v51 = vadd.f32 1.0, %v2018_v62  ;;  %2039 = vpow2.f32 %v685_v5  ;;  %v619_v10 = vsub.f32 0.0, %v453_v53  ;;  %603 = vst [vmem:[%s2825_s23 + $0xb0] sm:$0xff] %v533_v57 }
 0x105   : > { %3506 = vst [vmem:[#allocation27_spill] sm:$0xff] %v2875_v3  ;;  %v2020_v28 = vpop.eup %2019  ;;  %v997_v56 = vfloor.f32 %v2860_v20  ;;  %v2882_v19 = vmul.f32 1.442695, %v620_v45  ;;  %v635_v44 = vsub.f32 0.0, %v533_v57  ;;  %590 = vst [vmem:[%s2825_s23 + $0x48] sm:$0xff] %v468_v27  ;;  %v2888_v13 = vmul.f32 0.00390625, %v3474_v2 }
 0x106   : > { %v2022_v12 = vpop.eup %2021  ;;  %v726_v50 = vadd.f32 1.0, %v2020_v28  ;;  %606 = vst [vmem:[%s2825_s23 + $0xc8] sm:$0xff] %v548_v35  ;;  %2041 = vrcp.f32 %v710_v51  ;;  %v622_v5 = vsub.f32 0.0, %v468_v27  ;;  %v463_v53 = vadd.f32 %v2785_v8, %v462_v60  ;;  %v1938_v40 = vpop.f32.mrb[10].mxu0 }
 0x107   : > { %3507 = vst [vmem:[#allocation28_spill] sm:$0xff] %v2888_v13  ;;  %v2024_v38 = vpop.eup %2023  ;;  %v709_v42 = vadd.f32 1.0, %v2022_v12  ;;  %v1962_v20 = vpop.f32.mrb[10].mxu1  ;;  %v2891_v62 = vmul.f32 1.442695, %v636_v16  ;;  %v638_v57 = vsub.f32 0.0, %v548_v35  ;;  %v478_v16 = vadd.f32 %v1938_v40, %v2785_v8 }
 0x108   : > { %v2026_v43 = vpop.eup %2025  ;;  %2043 = vrcp.f32 %v726_v50  ;;  %v725_v45 = vadd.f32 1.0, %v2024_v38  ;;  %v472_v28 = vpop.f32.mrb[11].mxu0  ;;  %v2893_v29 = vmul.f32 1.442695, %v619_v10  ;;  %v2895_v51 = vmul.f32 1.442695, %v635_v44 }
 0x109   : > { %v2028_v37 = vpop.eup %2027  ;;  %2045 = vrcp.f32 %v709_v42  ;;  %v712_v2 = vadd.f32 1.0, %v2026_v43  ;;  %589 = vst [vmem:[%s2825_s23 + $0x40] sm:$0xff] %v463_v53  ;;  %v552_v27 = vpop.f32.mrb[11].mxu1  ;;  %v543_v50 = vadd.f32 %v2785_v8, %v542_v54  ;;  %v2900_v26 = vmul.f32 1.442695, %v622_v5  ;;  %592 = vst [vmem:[%s2825_s23 + $0x58] sm:$0xff] %v478_v16 }
 0x10a   : > { %v2030_v12 = vpop.eup %2029  ;;  %2047 = vrcp.f32 %v725_v45  ;;  %v728_v60 = vadd.f32 1.0, %v2028_v37  ;;  %v621_v42 = vsub.f32 0.0, %v463_v53  ;;  %v558_v10 = vadd.f32 %v1962_v20, %v2785_v8  ;;  %v1941_v44 = vpop.f32.mrb[12].mxu0 }
 0x10b   : > { %v2032_v35 = vpop.eup %2031  ;;  %v711_v38 = vadd.f32 1.0, %v2030_v12  ;;  %v1965_v43 = vpop.f32.mrb[12].mxu1  ;;  %2049 = vrcp.f32 %v712_v2  ;;  %v2903_v45 = vmul.f32 1.442695, %v638_v57  ;;  %605 = vst [vmem:[%s2825_s23 + $0xc0] sm:$0xff] %v543_v50  ;;  %v2909_v40 = vmul.f32 256.0, %v997_v56 }
 0x10c   : > { %v2034_v3 = vpop.eup %2033  ;;  %v727_v34 = vadd.f32 1.0, %v2032_v35  ;;  %v482_v37 = vpop.f32.mrb[13].mxu0  ;;  %2051 = vrcp.f32 %v728_v60  ;;  %v637_v20 = vsub.f32 0.0, %v543_v50  ;;  %608 = vst [vmem:[%s2825_s23 + $0xd8] sm:$0xff] %v558_v10  ;;  %v2913_v12 = vadd.f32 %v2785_v8, %v472_v28  ;;  %v2927_v28 = vld [vmem:[%s3470_s2 + $0x6] ss:$0 sm:$0xff] }
 0x10d   : > { %v2907_v54 = vpop.f32.mrb[13].mxu1  ;;  %3508 = vst [vmem:[#allocation29_spill] sm:$0xff] %v2909_v40  ;;  %v2036_v5 = vpop.eup %2035  ;;  %v714_v53 = vadd.f32 1.0, %v2034_v3  ;;  %2053 = vrcp.f32 %v711_v38  ;;  %v624_v35 = vsub.f32 0.0, %v478_v16  ;;  %v640_v49 = vsub.f32 0.0, %v558_v10 }
 0x10e   : > { %v2038_v2 = vpop.eup %2037  ;;  %v730_v57 = vadd.f32 1.0, %v2036_v5  ;;  %2055 = vrcp.f32 %v727_v34  ;;  %v2915_v6 = vmul.f32 1.442695, %v621_v42  ;;  %591 = vst [vmem:[%s2825_s23 + $0x50] sm:$0xff] %v2913_v12  ;;  %v2919_v56 = vpop.f32.mrb[14].mxu0  ;;  %v2930_v34 = vadd.f32 %v2785_v8, %v552_v27 }
 0x10f   : > { %v2040_v41 = vpop.eup %2039  ;;  %v713_v0 = vadd.f32 1.0, %v2038_v2  ;;  %3509 = vst [vmem:[#allocation30_spill] sm:$0xff] %v2919_v56  ;;  %v2922_v60 = vpop.f32.mrb[14].mxu1  ;;  %2057 = vrcp.f32 %v714_v53  ;;  %v2933_v16 = vadd.f32 %v1941_v44, %v2785_v8  ;;  %v2939_v5 = vmul.f32 1.442695, %v637_v20 }
 0x110   : > { %3510 = vst [vmem:[#allocation31_spill] sm:$0xff] %v2922_v60  ;;  %v729_v50 = vadd.f32 1.0, %v2040_v41  ;;  %v2935_v38 = vpop.f32.mrb[15].mxu0  ;;  %v2937_v42 = vpop.f32.mrb[15].mxu1  ;;  %2059 = vrcp.f32 %v730_v57  ;;  %v2942_v53 = vadd.f32 %v1965_v43, %v2785_v8  ;;  %v2945_v41 = vadd.f32 %v2785_v8, %v482_v37  ;;  %607 = vst [vmem:[%s2825_s23 + $0xd0] sm:$0xff] %v2930_v34 }
 0x111   : > { %3511 = vst [vmem:[#allocation32_spill] sm:$0xff] %v2935_v38  ;;  %3512 = vst [vmem:[#allocation33_spill] sm:$0xff] %v2937_v42  ;;  %v2042_v10 = vpop.eup %2041  ;;  %2061 = vrcp.f32 %v713_v0  ;;  %v2947_v44 = vmul.f32 1.442695, %v624_v35  ;;  %v2949_v3 = vmul.f32 1.442695, %v640_v49 }
 0x112   : > { %3513 = vst [vmem:[#allocation34_spill] sm:$0xff] %v2945_v41  ;;  %v2044_v27 = vpop.eup %2043  ;;  %v806_v2 = vmul.f32 2.0, %v2042_v10  ;;  %594 = vst [vmem:[%s2825_s23 + $0x68] sm:$0xff] %v2933_v16  ;;  %v2958_v43 = vld [vmem:[%s3470_s2 + $0x1] ss:$0 sm:$0xff]  ;;  %v1571_v37 = vmul.f32 %v2042_v10, %v2927_v28  ;;  %2063 = vrcp.f32 %v729_v50 }
 0x113   : > { %v2046_v20 = vpop.eup %2045  ;;  %v822_v57 = vmul.f32 2.0, %v2044_v27  ;;  %610 = vst [vmem:[%s2825_s23 + $0xe8] sm:$0xff] %v2942_v53  ;;  %593 = vst [vmem:[%s2825_s23 + $0x60] sm:$0xff] %v2945_v41  ;;  %v1587_v4 = vmul.f32 %v2044_v27, %v2927_v28  ;;  %2065 = vpow2.f32 %v2882_v19  ;;  %v2980_v27 = vld [vmem:[%s3470_s2 + $0x5] ss:$0 sm:$0xff] }
 0x114   : > { %v2048_v49 = vpop.eup %2047  ;;  %v1841_v35 = vadd.f32 -0.5, %v806_v2  ;;  %v1395_v42 = vmul.f32 %v806_v2, %v806_v2  ;;  %v805_v1 = vmul.f32 2.0, %v2046_v20  ;;  %v2975_v2 = vld [vmem:[%s3470_s2 + $0x4] ss:$0 sm:$0xff]  ;;  %v1570_v61 = vmul.f32 %v2046_v20, %v2927_v28 }
 0x115   : > { %v1857_v14 = vadd.f32 -0.5, %v822_v57  ;;  %v1411_v15 = vmul.f32 %v822_v57, %v822_v57  ;;  %v821_v7 = vmul.f32 2.0, %v2048_v49  ;;  %v2050_v10 = vpop.eup %2049  ;;  %2067 = vpow2.f32 %v2891_v62 }
 0x116   : > { %v1331_v50 = vadd.f32 %v1841_v35, %v2496_v23  ;;  %v1431_v0 = vmul.f32 %v2958_v43, %v1395_v42  ;;  %v1840_v22 = vadd.f32 -0.5, %v805_v1  ;;  %v1394_v46 = vmul.f32 %v805_v1, %v805_v1  ;;  %v2970_v63 = vpop.eup %2051 }
 0x117   : > { %v1347_v19 = vadd.f32 %v1857_v14, %v2525_v52  ;;  %v1447_v23 = vmul.f32 %v2958_v43, %v1411_v15  ;;  %v1856_v57 = vadd.f32 -0.5, %v821_v7  ;;  %v1410_v42 = vmul.f32 %v821_v7, %v821_v7  ;;  %v2984_v35 = vpop.eup %2053 }
 0x118   : > { %v1363_v1 = vmul.f32 8.0, %v1331_v50  ;;  %v1330_v38 = vadd.f32 %v1840_v22, %v2529_v55  ;;  %v1430_v25 = vmul.f32 %v2958_v43, %v1394_v46  ;;  %v2989_v33 = vpop.eup %2055  ;;  %v1586_v15 = vmul.f32 %v2048_v49, %v2927_v28 }
 0x119   : > { %v1379_v41 = vmul.f32 8.0, %v1347_v19  ;;  %v1346_v36 = vadd.f32 %v1856_v57, %v2534_v47  ;;  %v1446_v52 = vmul.f32 %v2958_v43, %v1410_v42  ;;  %v2994_v14 = vpop.eup %2057  ;;  %v1503_v50 = vmul.f32 %v2980_v27, %v1431_v0 }
 0x11a   : > { %v1467_v7 = vmul.f32 %v2975_v2, %v1363_v1  ;;  %v1362_v55 = vmul.f32 8.0, %v1330_v38  ;;  %v808_v22 = vmul.f32 2.0, %v2050_v10  ;;  %v2998_v46 = vpop.eup %2059  ;;  %v1519_v19 = vmul.f32 %v2980_v27, %v1447_v23 }
 0x11b   : > { %v1483_v20 = vmul.f32 %v2975_v2, %v1379_v41  ;;  %v1502_v47 = vmul.f32 %v2980_v27, %v1430_v25  ;;  %v1378_v57 = vmul.f32 8.0, %v1346_v36  ;;  %v3003_v42 = vpop.eup %2061  ;;  %v1518_v41 = vmul.f32 %v2980_v27, %v1446_v52 }
 0x11c   : > { %v1535_v49 = vadd.f32 %v1503_v50, %v1467_v7  ;;  %v1466_v21 = vmul.f32 %v2975_v2, %v1362_v55  ;;  %v1843_v60 = vadd.f32 -0.5, %v808_v22  ;;  %v1397_v1 = vmul.f32 %v808_v22, %v808_v22  ;;  %v3006_v0 = vpop.eup %2063 }
 0x11d   : > { %v1551_v38 = vadd.f32 %v1519_v19, %v1483_v20  ;;  %v1482_v13 = vmul.f32 %v2975_v2, %v1378_v57  ;;  %v824_v23 = vmul.f32 2.0, %v2970_v63  ;;  %v3013_v50 = vpop.eup %2065  ;;  %2069 = vpow2.f32 %v2893_v29 }
 0x11e   : > { %v1603_v17 = vadd.f32 %v1571_v37, %v1535_v49  ;;  %v1534_v25 = vadd.f32 %v1502_v47, %v1466_v21  ;;  %v1333_v36 = vadd.f32 %v1843_v60, %v2536_v59  ;;  %v1433_v7 = vmul.f32 %v2958_v43, %v1397_v1 }
 0x11f   : > { %v1619_v55 = vadd.f32 %v1587_v4, %v1551_v38  ;;  %v1550_v40 = vadd.f32 %v1518_v41, %v1482_v13  ;;  %v1859_v22 = vadd.f32 -0.5, %v824_v23  ;;  %v1413_v56 = vmul.f32 %v824_v23, %v824_v23 }
 0x120   : > { %1635 = vst [vmem:[%s3017_s9 + $0x8] sm:$0xff] %v1603_v17  ;;  %v1602_v37 = vadd.f32 %v1570_v61, %v1534_v25  ;;  %v1365_v21 = vmul.f32 8.0, %v1333_v36  ;;  %v1573_v59 = vmul.f32 %v2050_v10, %v2927_v28  ;;  %v807_v60 = vmul.f32 2.0, %v2984_v35 }
 0x121   : > { %1651 = vst [vmem:[%s3017_s9 + $0x88] sm:$0xff] %v1619_v55  ;;  %v1618_v52 = vadd.f32 %v1586_v15, %v1550_v40  ;;  %v1505_v4 = vmul.f32 %v2980_v27, %v1433_v7  ;;  %v1349_v13 = vadd.f32 %v1859_v22, %v2566_v24  ;;  %v1449_v20 = vmul.f32 %v2958_v43, %v1413_v56 }
 0x122   : > { %1634 = vst [vmem:[%s3017_s9] sm:$0xff] %v1602_v37  ;;  %v1469_v19 = vmul.f32 %v2975_v2, %v1365_v21  ;;  %v1842_v47 = vadd.f32 -0.5, %v807_v60  ;;  %v1396_v57 = vmul.f32 %v807_v60, %v807_v60  ;;  %v823_v17 = vmul.f32 2.0, %v2989_v33 }
 0x123   : > { %1650 = vst [vmem:[%s3017_s9 + $0x80] sm:$0xff] %v1618_v52  ;;  %v1381_v61 = vmul.f32 8.0, %v1349_v13  ;;  %v1521_v10 = vmul.f32 %v2980_v27, %v1449_v20  ;;  %v1589_v40 = vmul.f32 %v2970_v63, %v2927_v28  ;;  %v810_v15 = vmul.f32 2.0, %v2994_v14 }
 0x124   : > { %v1537_v49 = vadd.f32 %v1505_v4, %v1469_v19  ;;  %v1332_v24 = vadd.f32 %v1842_v47, %v2575_v18  ;;  %v1432_v56 = vmul.f32 %v2958_v43, %v1396_v57  ;;  %v1858_v1 = vadd.f32 -0.5, %v823_v17 }
 0x125   : > { %v1485_v38 = vmul.f32 %v2975_v2, %v1381_v61  ;;  %v1412_v41 = vmul.f32 %v823_v17, %v823_v17  ;;  %v1845_v23 = vadd.f32 -0.5, %v810_v15  ;;  %v1399_v25 = vmul.f32 %v810_v15, %v810_v15 }
 0x126   : > { %v1605_v36 = vadd.f32 %v1573_v59, %v1537_v49  ;;  %v1364_v7 = vmul.f32 8.0, %v1332_v24  ;;  %v1572_v55 = vmul.f32 %v2984_v35, %v2927_v28  ;;  %v1348_v63 = vadd.f32 %v1858_v1, %v2577_v30 }
 0x127   : > { %v1553_v22 = vadd.f32 %v1521_v10, %v1485_v38  ;;  %v1448_v37 = vmul.f32 %v2958_v43, %v1412_v41  ;;  %v1335_v18 = vadd.f32 %v1845_v23, %v2607_v9  ;;  %v1435_v21 = vmul.f32 %v2958_v43, %v1399_v25 }
 0x128   : > { %1637 = vst [vmem:[%s3017_s9 + $0x18] sm:$0xff] %v1605_v36  ;;  %v1468_v60 = vmul.f32 %v2975_v2, %v1364_v7  ;;  %v1504_v52 = vmul.f32 %v2980_v27, %v1432_v56  ;;  %v1380_v59 = vmul.f32 8.0, %v1348_v63  ;;  %v826_v4 = vmul.f32 2.0, %v2998_v46 }
 0x129   : > { %v1621_v13 = vadd.f32 %v1589_v40, %v1553_v22  ;;  %v1520_v35 = vmul.f32 %v2980_v27, %v1448_v37  ;;  %v1588_v30 = vmul.f32 %v2989_v33, %v2927_v28  ;;  %v1367_v20 = vmul.f32 8.0, %v1335_v18 }
 0x12a   : > { %v1536_v19 = vadd.f32 %v1504_v52, %v1468_v60  ;;  %v1484_v9 = vmul.f32 %v2975_v2, %v1380_v59  ;;  %v1861_v47 = vadd.f32 -0.5, %v826_v4  ;;  %v1415_v57 = vmul.f32 %v826_v4, %v826_v4 }
 0x12b   : > { %1653 = vst [vmem:[%s3017_s9 + $0x98] sm:$0xff] %v1621_v13  ;;  %v1471_v17 = vmul.f32 %v2975_v2, %v1367_v20  ;;  %v1507_v61 = vmul.f32 %v2980_v27, %v1435_v21  ;;  %v1575_v10 = vmul.f32 %v2994_v14, %v2927_v28  ;;  %v809_v40 = vmul.f32 2.0, %v3003_v42 }
 0x12c   : > { %v1604_v15 = vadd.f32 %v1572_v55, %v1536_v19  ;;  %v1552_v49 = vadd.f32 %v1520_v35, %v1484_v9  ;;  %v1351_v33 = vadd.f32 %v1861_v47, %v2626_v58  ;;  %v1451_v24 = vmul.f32 %v2958_v43, %v1415_v57  ;;  %v3517_v47 = vld [vmem:[#allocation30_spill] sm:$0xff] }
 0x12d   : > { %v1539_v56 = vadd.f32 %v1507_v61, %v1471_v17  ;;  %v1844_v1 = vadd.f32 -0.5, %v809_v40  ;;  %v1398_v38 = vmul.f32 %v809_v40, %v809_v40  ;;  %v825_v41 = vmul.f32 2.0, %v3006_v0  ;;  %v3518_v17 = vld [vmem:[#allocation29_spill] sm:$0xff]  ;;  %v3519_v61 = vld [vmem:[#allocation19_spill] sm:$0xff] }
 0x12e   : > { %1636 = vst [vmem:[%s3017_s9 + $0x10] sm:$0xff] %v1604_v15  ;;  %v1620_v23 = vadd.f32 %v1588_v30, %v1552_v49  ;;  %v1383_v25 = vmul.f32 8.0, %v1351_v33  ;;  %v1523_v14 = vmul.f32 %v2980_v27, %v1451_v24  ;;  %v3514_v36 = vsub.f32 0.0, %v2913_v12  ;;  %v3521_v15 = vld [vmem:[#allocation28_spill] sm:$0xff] }
 0x12f   : > { %v1607_v55 = vadd.f32 %v1575_v10, %v1539_v56  ;;  %v1334_v63 = vadd.f32 %v1844_v1, %v2635_v31  ;;  %v1434_v58 = vmul.f32 %v2958_v43, %v1398_v38  ;;  %v1860_v22 = vadd.f32 -0.5, %v825_v41 }
 0x130   : > { %v665_v7 = vmul.f32 1.442695, %v3514_v36  ;;  %1652 = vst [vmem:[%s3017_s9 + $0x90] sm:$0xff] %v1620_v23  ;;  %v1487_v37 = vmul.f32 %v2975_v2, %v1383_v25  ;;  %v1414_v18 = vmul.f32 %v825_v41, %v825_v41  ;;  %v716_v21 = vadd.f32 1.0, %v3013_v50  ;;  %v3524_v41 = vld [vmem:[#allocation26_spill] sm:$0xff]  ;;  %v3525_v23 = vld [vmem:[#allocation9_spill] sm:$0xff] }
 0x131   : > { %1639 = vst [vmem:[%s3017_s9 + $0x28] sm:$0xff] %v1607_v55  ;;  %v1366_v60 = vmul.f32 8.0, %v1334_v63  ;;  %v1350_v52 = vadd.f32 %v1860_v22, %v2637_v32  ;;  %v639_v12 = vsub.f32 0.0, %v2930_v34  ;;  %v1591_v59 = vmul.f32 %v2998_v46, %v2927_v28 }
 0x132   : > { %v1555_v31 = vadd.f32 %v1523_v14, %v1487_v37  ;;  %v1450_v4 = vmul.f32 %v2958_v43, %v1414_v18  ;;  %2071 = vrcp.f32 %v716_v21  ;;  %v1506_v62 = vmul.f32 %v2980_v27, %v1434_v58  ;;  %v3527_v37 = vld [vmem:[#allocation16_spill] sm:$0xff] }
 0x133   : > { %v1470_v50 = vmul.f32 %v2975_v2, %v1366_v60  ;;  %v1382_v13 = vmul.f32 8.0, %v1350_v52  ;;  %2073 = vpow2.f32 %v2895_v51  ;;  %v1574_v29 = vmul.f32 %v3003_v42, %v2927_v28 }
 0x134   : > { %v1623_v32 = vadd.f32 %v1591_v59, %v1555_v31  ;;  %2075 = vpow2.f32 %v2900_v26  ;;  %v626_v34 = vsub.f32 0.0, %v2933_v16  ;;  %v1522_v30 = vmul.f32 %v2980_v27, %v1450_v4  ;;  %v3528_v31 = vld [vmem:[#allocation25_spill] sm:$0xff] }
 0x135   : > { %v1538_v35 = vadd.f32 %v1506_v62, %v1470_v50  ;;  %v1486_v46 = vmul.f32 %v2975_v2, %v1382_v13  ;;  %2077 = vpow2.f32 %v2903_v45  ;;  %v1590_v51 = vmul.f32 %v3006_v0, %v2927_v28  ;;  %v3099_v0 = vld [vmem:[%s3470_s2 + $0x3] ss:$0 sm:$0xff] }
 0x136   : > { %1655 = vst [vmem:[%s3017_s9 + $0xa8] sm:$0xff] %v1623_v32  ;;  %2079 = vpow2.f32 %v2915_v6  ;;  %v697_v42 = vmul.f32 1.442695, %v639_v12  ;;  %v563_v26 = vadd.f32 %v2785_v8, %v2907_v54  ;;  %v642_v19 = vsub.f32 0.0, %v2942_v53 }
 0x137   : > { %v1606_v16 = vadd.f32 %v1574_v29, %v1538_v35  ;;  %v1554_v20 = vadd.f32 %v1522_v30, %v1486_v46  ;;  %2081 = vpow2.f32 %v2939_v5  ;;  %v671_v45 = vmul.f32 1.442695, %v626_v34 }
 0x138   : > { %2083 = vpow2.f32 %v2947_v44  ;;  %v3515_v6 = vfloor.f32 %v2751_v11  ;;  %609 = vst [vmem:[%s2825_s23 + $0xe0] sm:$0xff] %v563_v26  ;;  %v935_v54 = vcvt.s32.f32 %v2838_v48  ;;  %v3516_v53 = vfloor.f32 %v2821_v39  ;;  %v2068_v11 = vpop.eup %2067 }
 0x139   : > { %1638 = vst [vmem:[%s3017_s9 + $0x20] sm:$0xff] %v1606_v16  ;;  %v1622_v5 = vadd.f32 %v1590_v51, %v1554_v20  ;;  %2085 = vpow2.f32 %v2949_v3  ;;  %v3116_v57 = vadd.f32 %v3517_v47, %v2785_v8  ;;  %v3520_v10 = vcvt.s32.f32 %v3519_v61  ;;  %v3523_v3 = vld [vmem:[#allocation31_spill] sm:$0xff]  ;;  %v2070_v56 = vpop.eup %2069  ;;  %v3530_v51 = vld [vmem:[#allocation10_spill] sm:$0xff] }
 0x13a   : > { %v3104_v9 = vmul.f32 %v3099_v0, %v3515_v6  ;;  %v3112_v44 = vmul.f32 16.0, %v3516_v53  ;;  %2087 = vpow2.f32 %v665_v7  ;;  %v3522_v49 = vfloor.f32 %v3521_v15  ;;  %v3526_v7 = vld [vmem:[#allocation34_spill] sm:$0xff] }
 0x13b   : > { %v3121_v40 = vsub.f32 %v3520_v10, %v3518_v17  ;;  %v3127_v24 = vadd.f32 %v3523_v3, %v2785_v8  ;;  %1654 = vst [vmem:[%s3017_s9 + $0xa0] sm:$0xff] %v1622_v5  ;;  %v732_v1 = vadd.f32 1.0, %v2068_v11  ;;  %2089 = vpow2.f32 %v697_v42  ;;  %596 = vst [vmem:[%s2825_s23 + $0x78] sm:$0xff] %v3116_v57 }
 0x13c   : > { %v1016_v33 = vmul.f32 256.0, %v3522_v49  ;;  %v703_v38 = vmul.f32 1.442695, %v642_v19  ;;  %v3134_v25 = vadd.s32 %v3525_v23, %v3524_v41  ;;  %v2072_v14 = vpop.eup %2071  ;;  %v715_v36 = vadd.f32 1.0, %v2070_v56  ;;  %v3531_v56 = vld [vmem:[#allocation32_spill] sm:$0xff] }
 0x13d   : > { %2091 = vpow2.f32 %v671_v45  ;;  %v625_v55 = vsub.f32 0.0, %v3526_v7  ;;  %v641_v63 = vsub.f32 0.0, %v563_v26  ;;  %612 = vst [vmem:[%s2825_s23 + $0xf8] sm:$0xff] %v3127_v24  ;;  %v2074_v58 = vpop.eup %2073  ;;  %v812_v22 = vmul.f32 2.0, %v2072_v14 }
 0x13e   : > { %2093 = vrcp.f32 %v732_v1  ;;  %v1174_v18 = vsub.f32 %v3527_v37, %v3112_v44  ;;  %v968_v21 = vmul.f32 0.00390625, %v935_v54  ;;  %v2076_v60 = vpop.eup %2075  ;;  %v731_v52 = vadd.f32 1.0, %v2074_v58 }
 0x13f   : > { %2095 = vrcp.f32 %v715_v36  ;;  %v3144_v12 = vmul.f32 0.0625, %v3121_v40  ;;  %v3529_v59 = vcvt.s32.f32 %v3528_v31  ;;  %v2078_v50 = vpop.eup %2077  ;;  %v1847_v62 = vadd.f32 -0.5, %v812_v22 }
 0x140   : > { %v1401_v13 = vmul.f32 %v812_v22, %v812_v22  ;;  %v718_v32 = vadd.f32 1.0, %v2076_v60  ;;  %2097 = vpow2.f32 %v703_v38  ;;  %v2080_v29 = vpop.eup %2079  ;;  %v734_v34 = vadd.f32 1.0, %v2078_v50 }
 0x141   : > { %v3148_v4 = vsub.f32 %v3529_v59, %v1016_v33  ;;  %2099 = vrcp.f32 %v731_v52  ;;  %v669_v35 = vmul.f32 1.442695, %v625_v55  ;;  %v3150_v46 = vmul.f32 1.442695, %v641_v63  ;;  %v2082_v30 = vpop.eup %2081 }
 0x142   : > { %v1337_v42 = vadd.f32 %v1847_v62, %v3530_v51  ;;  %v1437_v26 = vmul.f32 %v2958_v43, %v1401_v13  ;;  %2101 = vrcp.f32 %v718_v32  ;;  %v717_v16 = vadd.f32 1.0, %v2080_v29  ;;  %v2084_v20 = vpop.eup %2083 }
 0x143   : > { %v733_v19 = vadd.f32 1.0, %v2082_v30  ;;  %v628_v45 = vsub.f32 0.0, %v3116_v57  ;;  %v3156_v6 = vmul.f32 0.0625, %v3148_v4  ;;  %v644_v5 = vsub.f32 0.0, %v3127_v24  ;;  %v2086_v53 = vpop.eup %2085 }
 0x144   : > { %v1369_v47 = vmul.f32 8.0, %v1337_v42  ;;  %v1577_v11 = vmul.f32 %v2072_v14, %v2927_v28  ;;  %2103 = vrcp.f32 %v734_v34  ;;  %v720_v17 = vadd.f32 1.0, %v2084_v20  ;;  %v2088_v61 = vpop.eup %2087 }
 0x145   : > { %v1509_v10 = vmul.f32 %v2980_v27, %v1437_v26  ;;  %2105 = vrcp.f32 %v717_v16  ;;  %v736_v15 = vadd.f32 1.0, %v2086_v53  ;;  %v1000_v49 = vfloor.f32 %v968_v21  ;;  %v2090_v33 = vpop.eup %2089  ;;  %v3532_v26 = vld [vmem:[#allocation11_spill] sm:$0xff] }
 0x146   : > { %v1473_v57 = vmul.f32 %v2975_v2, %v1369_v47  ;;  %2107 = vrcp.f32 %v733_v19  ;;  %v719_v3 = vadd.f32 1.0, %v2088_v61  ;;  %v3164_v24 = vadd.f32 %v2785_v8, %v3531_v56  ;;  %v3533_v19 = vld [vmem:[#allocation12_spill] sm:$0xff] }
 0x147   : > { %v2092_v1 = vpop.eup %2091  ;;  %2109 = vrcp.f32 %v720_v17  ;;  %v735_v38 = vadd.f32 1.0, %v2090_v33  ;;  %v3166_v41 = vmul.f32 1.442695, %v628_v45  ;;  %v1032_v14 = vmul.f32 256.0, %v1000_v49 }
 0x148   : > { %v2094_v36 = vpop.eup %2093  ;;  %v1541_v7 = vadd.f32 %v1509_v10, %v1473_v57  ;;  %2111 = vrcp.f32 %v736_v15  ;;  %v722_v55 = vadd.f32 1.0, %v2092_v1  ;;  %v3168_v63 = vmul.f32 1.442695, %v644_v5  ;;  %595 = vst [vmem:[%s2825_s23 + $0x70] sm:$0xff] %v3164_v24 }
 0x149   : > { %v2096_v58 = vpop.eup %2095  ;;  %v828_v22 = vmul.f32 2.0, %v2094_v36  ;;  %v1593_v8 = vmul.f32 %v2094_v36, %v2927_v28  ;;  %2113 = vrcp.f32 %v719_v3  ;;  %v627_v21 = vsub.f32 0.0, %v3164_v24  ;;  %v3534_v3 = vld [vmem:[#allocation13_spill] sm:$0xff] }
 0x14a   : > { %v2098_v60 = vpop.eup %2097  ;;  %v1609_v52 = vadd.f32 %v1577_v11, %v1541_v7  ;;  %v811_v31 = vmul.f32 2.0, %v2096_v58  ;;  %2115 = vrcp.f32 %v735_v38  ;;  %v3176_v59 = vsub.f32 %v935_v54, %v1032_v14  ;;  %v3535_v14 = vld [vmem:[#allocation14_spill] sm:$0xff] }
 0x14b   : > { %v2100_v50 = vpop.eup %2099  ;;  %v1863_v62 = vadd.f32 -0.5, %v828_v22  ;;  %v1417_v13 = vmul.f32 %v828_v22, %v828_v22  ;;  %v1576_v32 = vmul.f32 %v2096_v58, %v2927_v28  ;;  %2117 = vrcp.f32 %v722_v55 }
 0x14c   : > { %v2102_v29 = vpop.eup %2101  ;;  %1641 = vst [vmem:[%s3017_s9 + $0x38] sm:$0xff] %v1609_v52  ;;  %v1846_v34 = vadd.f32 -0.5, %v811_v31  ;;  %v1400_v30 = vmul.f32 %v811_v31, %v811_v31  ;;  %v827_v51 = vmul.f32 2.0, %v2100_v50  ;;  %v3180_v42 = vadd.f32 1.0, %v2098_v60 }
 0x14d   : > { %v1353_v16 = vadd.f32 %v1863_v62, %v3532_v26  ;;  %v1453_v20 = vmul.f32 %v2958_v43, %v1417_v13  ;;  %v814_v48 = vmul.f32 2.0, %v2102_v29  ;;  %2119 = vpow2.f32 %v669_v35 }
 0x14e   : > { %v2104_v54 = vpop.eup %2103  ;;  %v1336_v45 = vadd.f32 %v1846_v34, %v3533_v19  ;;  %v1436_v5 = vmul.f32 %v2958_v43, %v1400_v30  ;;  %v1862_v53 = vadd.f32 -0.5, %v827_v51  ;;  %v1416_v47 = vmul.f32 %v827_v51, %v827_v51 }
 0x14f   : > { %v2106_v11 = vpop.eup %2105  ;;  %v1385_v17 = vmul.f32 8.0, %v1353_v16  ;;  %v1592_v61 = vmul.f32 %v2100_v50, %v2927_v28  ;;  %v1849_v10 = vadd.f32 -0.5, %v814_v48  ;;  %v1403_v15 = vmul.f32 %v814_v48, %v814_v48 }
 0x150   : > { %v3187_v49 = vpop.eup %2107  ;;  %v1525_v33 = vmul.f32 %v2980_v27, %v1453_v20  ;;  %v1368_v57 = vmul.f32 8.0, %v1336_v45  ;;  %v1352_v35 = vadd.f32 %v1862_v53, %v3534_v3  ;;  %v1452_v56 = vmul.f32 %v2958_v43, %v1416_v47  ;;  %v3536_v53 = vld [vmem:[#allocation15_spill] sm:$0xff] }
 0x151   : > { %v3192_v1 = vpop.eup %2109  ;;  %v1489_v38 = vmul.f32 %v2975_v2, %v1385_v17  ;;  %v1339_v36 = vadd.f32 %v1849_v10, %v3535_v14  ;;  %v1439_v7 = vmul.f32 %v2958_v43, %v1403_v15  ;;  %v830_v55 = vmul.f32 2.0, %v2104_v54 }
 0x152   : > { %v3197_v58 = vpop.eup %2111  ;;  %v1472_v22 = vmul.f32 %v2975_v2, %v1368_v57  ;;  %v1508_v60 = vmul.f32 %v2980_v27, %v1436_v5  ;;  %v1384_v52 = vmul.f32 8.0, %v1352_v35  ;;  %v1579_v31 = vmul.f32 %v2102_v29, %v2927_v28 }
 0x153   : > { %v3202_v50 = vpop.eup %2113  ;;  %v1557_v62 = vadd.f32 %v1525_v33, %v1489_v38  ;;  %v1524_v13 = vmul.f32 %v2980_v27, %v1452_v56  ;;  %v1371_v34 = vmul.f32 8.0, %v1339_v36  ;;  %v1865_v30 = vadd.f32 -0.5, %v830_v55  ;;  %v3537_v36 = vld [vmem:[#allocation17_spill] sm:$0xff] }
 0x154   : > { %v3205_v51 = vpop.eup %2115  ;;  %v1540_v26 = vadd.f32 %v1508_v60, %v1472_v22  ;;  %v1488_v16 = vmul.f32 %v2975_v2, %v1384_v52  ;;  %v1419_v20 = vmul.f32 %v830_v55, %v830_v55  ;;  %v813_v48 = vmul.f32 2.0, %v2106_v11 }
 0x155   : > { %v3208_v19 = vpop.eup %2117  ;;  %v1625_v45 = vadd.f32 %v1593_v8, %v1557_v62  ;;  %v1475_v29 = vmul.f32 %v2975_v2, %v1371_v34  ;;  %v1511_v5 = vmul.f32 %v2980_v27, %v1439_v7  ;;  %v1355_v47 = vadd.f32 %v1865_v30, %v3536_v53 }
 0x156   : > { %v1608_v17 = vadd.f32 %v1576_v32, %v1540_v26  ;;  %v1556_v10 = vadd.f32 %v1524_v13, %v1488_v16  ;;  %v1455_v15 = vmul.f32 %v2958_v43, %v1419_v20  ;;  %v1848_v33 = vadd.f32 -0.5, %v813_v48  ;;  %v3538_v26 = vld [vmem:[#allocation18_spill] sm:$0xff] }
 0x157   : > { %v3214_v57 = vpop.eup %2119  ;;  %1657 = vst [vmem:[%s3017_s9 + $0xb8] sm:$0xff] %v1625_v45  ;;  %v1543_v3 = vadd.f32 %v1511_v5, %v1475_v29  ;;  %v1387_v35 = vmul.f32 8.0, %v1355_v47  ;;  %v1402_v56 = vmul.f32 %v813_v48, %v813_v48  ;;  %v829_v8 = vmul.f32 2.0, %v3187_v49 }
 0x158   : > { %1640 = vst [vmem:[%s3017_s9 + $0x30] sm:$0xff] %v1608_v17  ;;  %v1624_v38 = vadd.f32 %v1592_v61, %v1556_v10  ;;  %v1527_v14 = vmul.f32 %v2980_v27, %v1455_v15  ;;  %v1595_v32 = vmul.f32 %v2104_v54, %v2927_v28  ;;  %v1338_v7 = vadd.f32 %v1848_v33, %v3537_v36  ;;  %v3539_v15 = vld [vmem:[#allocation20_spill] sm:$0xff] }
 0x159   : > { %v1611_v55 = vadd.f32 %v1579_v31, %v1543_v3  ;;  %v1491_v22 = vmul.f32 %v2975_v2, %v1387_v35  ;;  %v1438_v60 = vmul.f32 %v2958_v43, %v1402_v56  ;;  %v1864_v52 = vadd.f32 -0.5, %v829_v8 }
 0x15a   : > { %1656 = vst [vmem:[%s3017_s9 + $0xb0] sm:$0xff] %v1624_v38  ;;  %v1370_v62 = vmul.f32 8.0, %v1338_v7  ;;  %v1578_v13 = vmul.f32 %v2106_v11, %v2927_v28  ;;  %v1418_v34 = vmul.f32 %v829_v8, %v829_v8  ;;  %v816_v30 = vmul.f32 2.0, %v3192_v1  ;;  %v3540_v8 = vld [vmem:[#allocation21_spill] sm:$0xff] }
 0x15b   : > { %1643 = vst [vmem:[%s3017_s9 + $0x48] sm:$0xff] %v1611_v55  ;;  %v1559_v61 = vadd.f32 %v1527_v14, %v1491_v22  ;;  %v1510_v54 = vmul.f32 %v2980_v27, %v1438_v60  ;;  %v1354_v16 = vadd.f32 %v1864_v52, %v3538_v26  ;;  %v832_v31 = vmul.f32 2.0, %v3197_v58 }
 0x15c   : > { %v1474_v20 = vmul.f32 %v2975_v2, %v1370_v62  ;;  %v1454_v48 = vmul.f32 %v2958_v43, %v1418_v34  ;;  %v1851_v45 = vadd.f32 -0.5, %v816_v30  ;;  %v1405_v29 = vmul.f32 %v816_v30, %v816_v30 }
 0x15d   : > { %v1627_v5 = vadd.f32 %v1595_v32, %v1559_v61  ;;  %v1386_v11 = vmul.f32 8.0, %v1354_v16  ;;  %v1867_v53 = vadd.f32 -0.5, %v832_v31  ;;  %v1421_v47 = vmul.f32 %v832_v31, %v832_v31  ;;  %v3541_v31 = vld [vmem:[#allocation22_spill] sm:$0xff] }
 0x15e   : > { %v1542_v17 = vadd.f32 %v1510_v54, %v1474_v20  ;;  %v1594_v10 = vmul.f32 %v3187_v49, %v2927_v28  ;;  %v1341_v33 = vadd.f32 %v1851_v45, %v3539_v15  ;;  %v1441_v3 = vmul.f32 %v2958_v43, %v1405_v29 }
 0x15f   : > { %1659 = vst [vmem:[%s3017_s9 + $0xc8] sm:$0xff] %v1627_v5  ;;  %v1490_v35 = vmul.f32 %v2975_v2, %v1386_v11  ;;  %v1526_v56 = vmul.f32 %v2980_v27, %v1454_v48  ;;  %v1357_v38 = vadd.f32 %v1867_v53, %v3540_v8  ;;  %v1457_v14 = vmul.f32 %v2958_v43, %v1421_v47 }
 0x160   : > { %v1610_v32 = vadd.f32 %v1578_v13, %v1542_v17  ;;  %v1373_v36 = vmul.f32 8.0, %v1341_v33  ;;  %v1581_v7 = vmul.f32 %v3192_v1, %v2927_v28  ;;  %v815_v49 = vmul.f32 2.0, %v3202_v50 }
 0x161   : > { %v1558_v55 = vadd.f32 %v1526_v56, %v1490_v35  ;;  %v1513_v22 = vmul.f32 %v2980_v27, %v1441_v3  ;;  %v1389_v60 = vmul.f32 8.0, %v1357_v38  ;;  %v1597_v52 = vmul.f32 %v3197_v58, %v2927_v28  ;;  %v3543_v35 = vld [vmem:[#allocation24_spill] sm:$0xff] }
 0x162   : > { %1642 = vst [vmem:[%s3017_s9 + $0x40] sm:$0xff] %v1610_v32  ;;  %v1477_v62 = vmul.f32 %v2975_v2, %v1373_v36  ;;  %v1850_v34 = vadd.f32 -0.5, %v815_v49  ;;  %v1404_v30 = vmul.f32 %v815_v49, %v815_v49  ;;  %v831_v13 = vmul.f32 2.0, %v3205_v51 }
 0x163   : > { %v1626_v61 = vadd.f32 %v1594_v10, %v1558_v55  ;;  %v1493_v1 = vmul.f32 %v2975_v2, %v1389_v60  ;;  %v1529_v54 = vmul.f32 %v2980_v27, %v1457_v14  ;;  %v818_v26 = vmul.f32 2.0, %v3208_v19  ;;  %v3542_v10 = vld [vmem:[#allocation23_spill] sm:$0xff] }
 0x164   : > { %v1545_v16 = vadd.f32 %v1513_v22, %v1477_v62  ;;  %v1340_v20 = vadd.f32 %v1850_v34, %v3541_v31  ;;  %v1440_v58 = vmul.f32 %v2958_v43, %v1404_v30  ;;  %v1866_v48 = vadd.f32 -0.5, %v831_v13 }
 0x165   : > { %1658 = vst [vmem:[%s3017_s9 + $0xc0] sm:$0xff] %v1626_v61  ;;  %v1561_v45 = vadd.f32 %v1529_v54, %v1493_v1  ;;  %v1420_v29 = vmul.f32 %v831_v13, %v831_v13  ;;  %v1853_v5 = vadd.f32 -0.5, %v818_v26  ;;  %v1407_v11 = vmul.f32 %v818_v26, %v818_v26  ;;  %v3545_v54 = vld [vmem:[#allocation8_spill] sm:$0xff] }
 0x166   : > { %v1613_v53 = vadd.f32 %v1581_v7, %v1545_v16  ;;  %v1372_v47 = vmul.f32 8.0, %v1340_v20  ;;  %v1580_v17 = vmul.f32 %v3202_v50, %v2927_v28  ;;  %v1356_v15 = vadd.f32 %v1866_v48, %v3542_v10  ;;  %v3311_v16 = vld [vmem:[%s3470_s2 + $0x2] ss:$0 sm:$0xff] }
 0x167   : > { %v1629_v33 = vadd.f32 %v1597_v52, %v1561_v45  ;;  %v1456_v3 = vmul.f32 %v2958_v43, %v1420_v29  ;;  %v1343_v56 = vadd.f32 %v1853_v5, %v3543_v35  ;;  %v1443_v8 = vmul.f32 %v2958_v43, %v1407_v11 }
 0x168   : > { %1645 = vst [vmem:[%s3017_s9 + $0x58] sm:$0xff] %v1613_v53  ;;  %v1476_v38 = vmul.f32 %v2975_v2, %v1372_v47  ;;  %v1512_v14 = vmul.f32 %v2980_v27, %v1440_v58  ;;  %v1388_v32 = vmul.f32 8.0, %v1356_v15  ;;  %2121 = vrcp.f32 %v3180_v42 }
 0x169   : > { %1661 = vst [vmem:[%s3017_s9 + $0xd8] sm:$0xff] %v1629_v33  ;;  %v1528_v50 = vmul.f32 %v2980_v27, %v1456_v3  ;;  %v1596_v36 = vmul.f32 %v3205_v51, %v2927_v28  ;;  %v1375_v7 = vmul.f32 8.0, %v1343_v56  ;;  %v721_v49 = vadd.f32 1.0, %v3214_v57 }
 0x16a   : > { %v1544_v55 = vadd.f32 %v1512_v14, %v1476_v38  ;;  %v1492_v22 = vmul.f32 %v2975_v2, %v1388_v32  ;;  %v1515_v60 = vmul.f32 %v2980_v27, %v1443_v8  ;;  %2123 = vpow2.f32 %v3150_v46 }
 0x16b   : > { %v1479_v42 = vmul.f32 %v2975_v2, %v1375_v7  ;;  %2125 = vrcp.f32 %v721_v49  ;;  %v673_v51 = vmul.f32 1.442695, %v627_v21  ;;  %v918_v52 = vcvt.s32.f32 %v3134_v25 }
 0x16c   : > { %v1612_v62 = vadd.f32 %v1580_v17, %v1544_v55  ;;  %v1560_v57 = vadd.f32 %v1528_v50, %v1492_v22  ;;  %v1583_v34 = vmul.f32 %v3208_v19, %v2927_v28  ;;  %2127 = vpow2.f32 %v3166_v41  ;;  %v2146_v28 = vld [vmem:[%s3470_s2] ss:$0 sm:$0xff]  ;;  %v3544_v41 = vld [vmem:[#allocation33_spill] sm:$0xff] }
 0x16d   : > { %v1547_v46 = vadd.f32 %v1515_v60, %v1479_v42  ;;  %2129 = vpow2.f32 %v3168_v63  ;;  %v951_v24 = vmul.f32 0.00390625, %v918_v52  ;;  %v573_v21 = vadd.f32 %v2146_v28, %v3544_v41 }
 0x16e   : > { %1644 = vst [vmem:[%s3017_s9 + $0x50] sm:$0xff] %v1612_v62  ;;  %v1628_v19 = vadd.f32 %v1596_v36, %v1560_v57  ;;  %v1126_v30 = vfloor.f32 %v3144_v12  ;;  %v3303_v13 = vmul.f32 0.0625, %v3176_v59  ;;  %2131 = vpow2.f32 %v673_v51 }
 0x16f   : > { %v1615_v63 = vadd.f32 %v1583_v34, %v1547_v46  ;;  %v983_v61 = vfloor.f32 %v951_v24  ;;  %611 = vst [vmem:[%s2825_s23 + $0xf0] sm:$0xff] %v573_v21  ;;  %v643_v1 = vsub.f32 0.0, %v573_v21  ;;  %v869_v26 = vadd.s32 240, %v3545_v54  ;;  %s1667_s23 = scalar_lea.sflag [#allocation3], %s2764_s13 }
 0x170   : > { %1660 = vst [vmem:[%s3017_s9 + $0xd0] sm:$0xff] %v1628_v19  ;;  %v1210_v31 = vmul.f32 %v3311_v16, %v1174_v18  ;;  %v3546_v20 = vfloor.f32 %v2821_v39  ;;  %v1113_v48 = vfloor.f32 %v3156_v6 }
 0x172   : > { %v1246_v58 = vmul.f32 %v3099_v0, %v3546_v20 }
 0x173   : > { %2165 = shalt.err (!%p2162_p3)
}
 0x174   : > { %s2166_s11 = scalar_lea.hbm %s3289_s27, 4096  ;;  %s2170_s28 = scalar_lea.hbm %s3471_s3, 8192 }
 0x175   : > { %p2167_p4 = scmp.ne.s32.totalorder %s3289_s27, %s2166_s11  ;;  %p2171_p9 = scmp.lt.u32.totalorder %s3289_s27, %s3471_s3 }
 0x176   : > { %p2172_p10 = scmp.lt.u32.totalorder %s2170_s28, %s2166_s11  ;;  %p2174_p12 = scmp.lt.u32.totalorder %s2166_s11, %s3289_s27 }
 0x177   : > { %p2168_p7 = pnand %p2167_p4, %p2315_p5 }
 0x178   : > { %p2173_p11 = por %p2172_p10, %p2171_p9 }
 0x179   : > { %p2169_p8 = pneg %p2168_p7 }
 0x17a   : > { %p2175_p13 = por %p2174_p12, %p2173_p11 }
 0x17c   : > { %p2176_p0 = pnand %p2175_p13, %p2169_p8 }
 0x17e   : > { %2179 = shalt.err (!%p2176_p0)
}
 0x17f   : > { %s2249_s5 = smov 128   ;;  %s2250_s6 = smov 8   ;;  %1647 = vst [vmem:[%s3017_s9 + $0x68] sm:$0xff] %v1615_v63  ;;  %v1015_v39 = vmul.f32 256.0, %v983_v61  ;;  %v705_v44 = vmul.f32 1.442695, %v643_v1  ;;  %v902_v37 = vadd.s32 %v3525_v23, %v869_v26  ;;  %v2122_v18 = vpop.eup %2121  ;;  %v1129_v29 = vfloor.f32 %v3303_v13 }
 0x180   : > { %1971 = dma.vmem_to_hbm [thread:$0]  (%p2315_p5), %s3291_s14, 4096, %s3289_s27, %s1667_s23, %s2249_s5, %s2249_s5, %s2250_s6   ;;  %v1158_v45 = vmul.f32 16.0, %v1126_v30  ;;  %v834_v5 = vmul.f32 2.0, %v2122_v18  ;;  %v3547_v11 = vld [vmem:[#allocation27_spill] sm:$0xff]  ;;  %v2124_v17 = vpop.eup %2123  ;;  %v1278_v10 = vadd.f32 %v1246_v58, %v1210_v31  ;;  %v1145_v23 = vmul.f32 16.0, %v1113_v48 }
 0x181   : > { %v1295_v53 = vadd.f32 %v3104_v9, %v3547_v11  ;;  %v3357_v47 = vsub.f32 %v918_v52, %v1015_v39  ;;  %2133 = vpow2.f32 %v705_v44  ;;  %v934_v15 = vcvt.s32.f32 %v902_v37  ;;  %v2126_v33 = vpop.eup %2125  ;;  %s1701_s22 = sshll.u32 %s3017_s9, 4  ;;  %s3419_s30 = scalar_lea.hbm %s3472_s4, %s1884_s12  ;;  %s3421_s22 = int_to_ptr.vmem [resolvable:$true] %s1701_s22 }
 0x182   : > { %v1869_v3 = vadd.f32 -0.5, %v834_v5  ;;  %v1423_v35 = vmul.f32 %v834_v5, %v834_v5  ;;  %v737_v56 = vadd.f32 1.0, %v2124_v17  ;;  %v2128_v38 = vpop.eup %2127  ;;  %v817_v14 = vmul.f32 2.0, %v2126_v33  ;;  %s1672_s14 = scalar_lea.sflag [#allocation5], %s2764_s13  ;;  %s2180_s27 = scalar_lea.vmem %s3421_s22, 4096 }
 0x183   : > { %v1080_v8 = vmul.f32 0.0625, %v3357_v47  ;;  %v1190_v9 = vsub.f32 %v3121_v40, %v1158_v45  ;;  %v1161_v25 = vmul.f32 16.0, %v1129_v29  ;;  %v967_v32 = vmul.f32 0.00390625, %v934_v15  ;;  %v2130_v50 = vpop.eup %2129  ;;  %p2181_p1 = scmp.ne.s32.totalorder %s3421_s22, %s2180_s27  ;;  %s2251_s23 = smov [#allocation4]  }
 0x184   : > { %v1359_v36 = vadd.f32 %v1869_v3, %v1295_v53  ;;  %v1459_v7 = vmul.f32 %v2958_v43, %v1423_v35  ;;  %2135 = vrcp.f32 %v737_v56  ;;  %v724_v49 = vadd.f32 1.0, %v2128_v38  ;;  %v2132_v55 = vpop.eup %2131  ;;  %s2184_s7 = sshll.u32 %s2251_s23, 4  ;;  %s2185_s7 = int_to_ptr.vmem [resolvable:$false] %s2184_s7 }
 0x185   : > { %v1852_v22 = vadd.f32 -0.5, %v817_v14  ;;  %v1406_v60 = vmul.f32 %v817_v14, %v817_v14  ;;  %v740_v42 = vadd.f32 1.0, %v2130_v50  ;;  %v1112_v51 = vfloor.f32 %v1080_v8  ;;  %p2182_p2 = pnand %p2181_p1, %p2315_p5  ;;  %s2186_s19 = scalar_lea.vmem %s2185_s7, 8192 }
 0x186   : > { %v1391_v52 = vmul.f32 8.0, %v1359_v36  ;;  %2137 = vrcp.f32 %v724_v49  ;;  %v1177_v62 = vsub.f32 %v3148_v4, %v1145_v23  ;;  %v723_v57 = vadd.f32 1.0, %v2132_v55  ;;  %p2187_p4 = scmp.lt.s32.totalorder %s3421_s22, %s2185_s7  ;;  %p2188_p7 = scmp.lt.s32.totalorder %s2186_s19, %s2180_s27 }
 0x187   : > { %v1342_v34 = vadd.f32 %v1852_v22, %v1278_v10  ;;  %v1442_v40 = vmul.f32 %v2958_v43, %v1406_v60  ;;  %2139 = vrcp.f32 %v740_v42  ;;  %v1144_v46 = vmul.f32 16.0, %v1112_v51  ;;  %v3376_v43 = vld [vmem:[%s3470_s2 + $0x6] ss:$0 sm:$0xff]  ;;  %p2183_p3 = pneg %p2182_p2 }
 0x188   : > { %v1495_v24 = vmul.f32 %v2975_v2, %v1391_v52  ;;  %v1531_v28 = vmul.f32 %v2980_v27, %v1459_v7  ;;  %2141 = vrcp.f32 %v723_v57  ;;  %v999_v41 = vfloor.f32 %v967_v32  ;;  %p2189_p8 = por %p2188_p7, %p2187_p4 }
 0x189   : > { %v1374_v21 = vmul.f32 8.0, %v1342_v34  ;;  %v1226_v19 = vmul.f32 %v3311_v16, %v1190_v9  ;;  %v1262_v13 = vmul.f32 %v3099_v0, %v1126_v30  ;;  %v1193_v4 = vsub.f32 %v3176_v59, %v1161_v25  ;;  %v2149_v25 = vld [vmem:[%s3470_s2 + $0x1] ss:$0 sm:$0xff] }
 0x18a   : > { %v1563_v61 = vadd.f32 %v1531_v28, %v1495_v24  ;;  %v1599_v1 = vmul.f32 %v3376_v43, %v2122_v18  ;;  %v1176_v54 = vsub.f32 %v3357_v47, %v1144_v46  ;;  %v1031_v26 = vmul.f32 256.0, %v999_v41  ;;  %v2150_v24 = vld [vmem:[%s3470_s2 + $0x4] ss:$0 sm:$0xff]  ;;  %v2151_v41 = vld [vmem:[%s3470_s2 + $0x5] ss:$0 sm:$0xff]  ;;  %p2190_p9 = pnand %p2189_p8, %p2183_p3 }
 0x18b   : > { %v2134_v63 = vpop.eup %2133  ;;  %v1478_v31 = vmul.f32 %v2975_v2, %v1374_v21  ;;  %v1514_v12 = vmul.f32 %v2980_v27, %v1442_v40  ;;  %v1249_v59 = vmul.f32 %v3099_v0, %v1113_v48  ;;  %v1213_v58 = vmul.f32 %v3311_v16, %v1177_v62 }
 0x18c   : > { %v739_v30 = vadd.f32 1.0, %v2134_v63  ;;  %v1631_v20 = vadd.f32 %v1599_v1, %v1563_v61  ;;  %v1265_v39 = vmul.f32 %v3099_v0, %v1129_v29  ;;  %v1063_v44 = vsub.f32 %v934_v15, %v1031_v26 }
 0x18d   : > { %v1546_v37 = vadd.f32 %v1514_v12, %v1478_v31  ;;  %v1582_v18 = vmul.f32 %v3376_v43, %v2126_v33  ;;  %v1229_v45 = vmul.f32 %v3311_v16, %v1193_v4  ;;  %v1212_v27 = vmul.f32 %v3311_v16, %v1176_v54 }
 0x18e   : > { %2143 = vrcp.f32 %v739_v30  ;;  %v2136_v2 = vpop.eup %2135  ;;  %1663 = vst [vmem:[%s3017_s9 + $0xe8] sm:$0xff] %v1631_v20  ;;  %v1248_v6 = vmul.f32 %v3099_v0, %v1112_v51  ;;  %v1096_v48 = vmul.f32 0.0625, %v1063_v44  ;;  %v1294_v53 = vadd.f32 %v1262_v13, %v1226_v19 }
 0x18f   : > { %v1614_v5 = vadd.f32 %v1582_v18, %v1546_v37  ;;  %v833_v11 = vmul.f32 2.0, %v2136_v2  ;;  %v1281_v29 = vadd.f32 %v1249_v59, %v1213_v58  ;;  %v1297_v3 = vadd.f32 %v1265_v39, %v1229_v45 }
 0x190   : > { %v2138_v47 = vpop.eup %2137  ;;  %v1128_v17 = vfloor.f32 %v1096_v48  ;;  %v1598_v56 = vmul.f32 %v3376_v43, %v2136_v2  ;;  %v1280_v38 = vadd.f32 %v1248_v6, %v1212_v27 }
 0x191   : > { %v2140_v10 = vpop.eup %2139  ;;  %1646 = vst [vmem:[%s3017_s9 + $0x60] sm:$0xff] %v1614_v5  ;;  %v1868_v23 = vadd.f32 -0.5, %v833_v11  ;;  %v1422_v15 = vmul.f32 %v833_v11, %v833_v11  ;;  %v820_v33 = vmul.f32 2.0, %v2138_v47  ;;  %v1585_v7 = vmul.f32 %v3376_v43, %v2138_v47 }
 0x192   : > { %v2142_v35 = vpop.eup %2141  ;;  %v836_v8 = vmul.f32 2.0, %v2140_v10  ;;  %v1160_v14 = vmul.f32 16.0, %v1128_v17  ;;  %v1264_v52 = vmul.f32 %v3099_v0, %v1128_v17  ;;  %v1601_v30 = vmul.f32 %v3376_v43, %v2140_v10 }
 0x193   : > { %v1358_v9 = vadd.f32 %v1868_v23, %v1294_v53  ;;  %v1458_v32 = vmul.f32 %v2149_v25, %v1422_v15  ;;  %v1855_v50 = vadd.f32 -0.5, %v820_v33  ;;  %v1409_v36 = vmul.f32 %v820_v33, %v820_v33 }
 0x194   : > { %v1871_v49 = vadd.f32 -0.5, %v836_v8  ;;  %v1425_v55 = vmul.f32 %v836_v8, %v836_v8  ;;  %v819_v22 = vmul.f32 2.0, %v2142_v35  ;;  %v1192_v13 = vsub.f32 %v1063_v44, %v1160_v14 }
 0x195   : > { %v1390_v60 = vmul.f32 8.0, %v1358_v9  ;;  %v1345_v42 = vadd.f32 %v1855_v50, %v1281_v29  ;;  %v1445_v51 = vmul.f32 %v2149_v25, %v1409_v36  ;;  %v1530_v21 = vmul.f32 %v2151_v41, %v1458_v32 }
 0x196   : > { %v1361_v62 = vadd.f32 %v1871_v49, %v1297_v3  ;;  %v1461_v57 = vmul.f32 %v2149_v25, %v1425_v55  ;;  %v1854_v34 = vadd.f32 -0.5, %v819_v22  ;;  %v1408_v40 = vmul.f32 %v819_v22, %v819_v22 }
 0x197   : > { %v1494_v28 = vmul.f32 %v2150_v24, %v1390_v60  ;;  %v1377_v19 = vmul.f32 8.0, %v1345_v42  ;;  %v1517_v4 = vmul.f32 %v2151_v41, %v1445_v51  ;;  %v1228_v31 = vmul.f32 %v3311_v16, %v1192_v13 }
 0x198   : > { %v2144_v46 = vpop.eup %2143  ;;  %v1393_v63 = vmul.f32 8.0, %v1361_v62  ;;  %v1344_v0 = vadd.f32 %v1854_v34, %v1280_v38  ;;  %v1444_v61 = vmul.f32 %v2149_v25, %v1408_v40  ;;  %v1533_v59 = vmul.f32 %v2151_v41, %v1461_v57 }
 0x199   : > { %v1562_v1 = vadd.f32 %v1530_v21, %v1494_v28  ;;  %v1481_v54 = vmul.f32 %v2150_v24, %v1377_v19  ;;  %v835_v26 = vmul.f32 2.0, %v2144_v46  ;;  %v1296_v44 = vadd.f32 %v1264_v52, %v1228_v31 }
 0x19a   : > { %v1497_v12 = vmul.f32 %v2150_v24, %v1393_v63  ;;  %v1376_v20 = vmul.f32 8.0, %v1344_v0  ;;  %v1516_v2 = vmul.f32 %v2151_v41, %v1444_v61  ;;  %v1584_v11 = vmul.f32 %v3376_v43, %v2142_v35 }
 0x19b   : > { %v1630_v58 = vadd.f32 %v1598_v56, %v1562_v1  ;;  %v1549_v39 = vadd.f32 %v1517_v4, %v1481_v54  ;;  %v1870_v37 = vadd.f32 -0.5, %v835_v26  ;;  %v1424_v27 = vmul.f32 %v835_v26, %v835_v26 }
 0x19c   : > { %v1565_v18 = vadd.f32 %v1533_v59, %v1497_v12  ;;  %v1480_v45 = vmul.f32 %v2150_v24, %v1376_v20  ;;  %v1600_v15 = vmul.f32 %v3376_v43, %v2144_v46 }
 0x19d   : > { %1662 = vst [vmem:[%s3017_s9 + $0xe0] sm:$0xff] %v1630_v58  ;;  %v1617_v6 = vadd.f32 %v1585_v7, %v1549_v39  ;;  %v1360_v16 = vadd.f32 %v1870_v37, %v1296_v44  ;;  %v1460_v53 = vmul.f32 %v2149_v25, %v1424_v27 }
 0x19e   : > { %v1633_v48 = vadd.f32 %v1601_v30, %v1565_v18  ;;  %v1548_v5 = vadd.f32 %v1516_v2, %v1480_v45 }
 0x19f   : > { %1649 = vst [vmem:[%s3017_s9 + $0x78] sm:$0xff] %v1617_v6  ;;  %v1392_v47 = vmul.f32 8.0, %v1360_v16  ;;  %v1532_v10 = vmul.f32 %v2151_v41, %v1460_v53 }
 0x1a0   : > { %1665 = vst [vmem:[%s3017_s9 + $0xf8] sm:$0xff] %v1633_v48  ;;  %v1616_v29 = vadd.f32 %v1584_v11, %v1548_v5 }
 0x1a1   : > { %v1496_v17 = vmul.f32 %v2150_v24, %v1392_v47 }
 0x1a2   : > { %1648 = vst [vmem:[%s3017_s9 + $0x70] sm:$0xff] %v1616_v29 }
 0x1a3   : > { %v1564_v23 = vadd.f32 %v1532_v10, %v1496_v17 }
 0x1a5   : > { %v1632_v33 = vadd.f32 %v1600_v15, %v1564_v23 }
 0x1a7   : > { %1664 = vst [vmem:[%s3017_s9 + $0xf0] sm:$0xff] %v1632_v33 }
 0x1a8   : > { %2193 = shalt.err (!%p2190_p9)
}
 0x1a9   : > { %s2194_s9 = scalar_lea.hbm %s3419_s30, 4096  ;;  %s2198_s10 = scalar_lea.hbm %s3472_s4, 8192 }
 0x1aa   : > { %p2195_p10 = scmp.ne.s32.totalorder %s3419_s30, %s2194_s9  ;;  %p2199_p13 = scmp.lt.u32.totalorder %s3419_s30, %s3472_s4 }
 0x1ab   : > { %p2200_p0 = scmp.lt.u32.totalorder %s2198_s10, %s2194_s9  ;;  %p2202_p2 = scmp.lt.u32.totalorder %s2194_s9, %s3419_s30 }
 0x1ac   : > { %p2196_p11 = pnand %p2195_p10, %p2315_p5 }
 0x1ad   : > { %p2201_p1 = por %p2200_p0, %p2199_p13 }
 0x1ae   : > { %p2197_p12 = pneg %p2196_p11 }
 0x1af   : > { %p2203_p3 = por %p2202_p2, %p2201_p1 }
 0x1b1   : > { %p2204_p4 = pnand %p2203_p3, %p2197_p12 }
 0x1b3   : > { %2207 = shalt.err (!%p2204_p4)
}
 0x1b4   : > { %1972 = dma.vmem_to_hbm [thread:$0]  (%p2315_p5), %s3421_s22, 4096, %s3419_s30, %s1672_s14, %s2249_s5, %s2249_s5, %s2250_s6  }
 0x1b5 PF: > { %p1982_p7 = scmp.ge.s32.totalorder %s2246_s18, 2  ;;  %s1716_s28 = sand.u32 1, %s2234_s15  }
 0x1b6   : > { %s1717_s29 = scalar_lea.sflag [#allocation3], %s1716_s28 }
 0x1b7   : > { %p1976_p8 = pnand %p1982_p7, %p2319_p6 }
 0x1b9   : > { %2225 = dma.done.wait (!%p1976_p8), %s1717_s29, 4096  }
 0x1ba   : > { %2227 = vsyncadd (!%p1976_p8), %s1717_s29, 4294963200  ;;  %s1726_s25 = scalar_lea.sflag [#allocation5], %s1716_s28 }
 0x1bb   : > { %2229 = dma.done.wait (!%p1976_p8), %s1726_s25, 4096  }
 0x1bc   : > { %2231 = vsyncadd (!%p1976_p8), %s1726_s25, 4294963200  ;;  %p18_p5 = scmp.ge.s32.totalorder %s2302_s21, 4   ;;  %s3548_s15 = smov %s2238_s16 }
 0x1bd   : > { %s3549_s16 = smov %s2242_s17  ;;  %s3550_s17 = smov %s2313_s24 }
 0x1be   : > { %s3551_s18 = smov %s2302_s21  ;;  %20 = sbr.rel (!%p18_p5) target bundleno = 5 (0x5), region = 84 }
 0x1c5   :  { %1731 = vsyncpa [#allocation3], 1 }
 0x1c6   :  { %1733 = vsyncpa [#allocation3 + $0x1], 1 }
 0x1c7   :  { %1734 = vsyncpa [#allocation5], 1 }
 0x1c8   :  { %1736 = vsyncpa [#allocation5 + $0x1], 1 }

</bundles_post_ra>
